<compile_context>
chip_gen: v7x
topology: tpu7x:2x2x1
jax: 0.10.0
libtpu: 0.0.40
codegen_flags: <defaults>
</compile_context>

<pallas_src>
import jax
import jax.numpy as jnp
from jax.experimental import pallas as pl
from jax.experimental.pallas import tpu as pltpu


def mine_kernel(x_ref, y_ref, w1x_ref, w1y_ref, b1_ref, w2r_ref, b2_ref, o_ref):
    # x_ref  : (TB, Dx)    y_ref  : (TB, Dy)
    # w1x_ref: (Dx, H)     w1y_ref: (Dy, H)     b1_ref: (1, H)
    # w2r_ref: (1, H)      b2_ref : (1, 1) in SMEM
    # o_ref  : (TB, 1)
    x = x_ref[...]
    y = y_ref[...]

    # Fused concat:  concat(x, y) @ W1  ==  x @ W1[:Dx] + y @ W1[Dx:]
    z1 = jnp.dot(x, w1x_ref[...], preferred_element_type=jnp.float32)
    z1 = z1 + jnp.dot(y, w1y_ref[...], preferred_element_type=jnp.float32)
    z1 = z1 + b1_ref[...]
    a1 = jnp.maximum(z1, 0.0)                       # ReLU on the VPU

    # fc2 (H -> 1): VPU multiply + XLU lane reduction (free slots next to the
    # MXU matmuls above) instead of a wasteful single-column MXU matmul.
    z2 = jnp.sum(a1 * w2r_ref[...], axis=-1, keepdims=True) + b2_ref[0, 0]
    o_ref[...] = z2.astype(o_ref.dtype)


def mine_forward(x, y, w1, b1, w2, b2, *, block_b=512):
    """Pallas-backed MINE forward.

    x: (B, Dx), y: (B, Dy); w1: (Dx+Dy, H), b1: (H,), w2: (H, 1), b2: (1,)
    Returns (B, 1) float32.
    """
    B, Dx = x.shape
    Dy = y.shape[1]
    D = Dx + Dy
    H = w1.shape[1]
    assert w1.shape[0] == D, "w1 must be (Dx+Dy, H) (pre-transposed)"

    # Pre-split W1 so the concat is fused into the kernel.
    w1x = w1[:Dx]
    w1y = w1[Dx:]
    b1_2d = b1.reshape(1, H)
    w2_row = w2.reshape(1, H)       # (H, 1) column -> (1, H) row for VPU reduce
    b2_2d = b2.reshape(1, 1)

    # Batch tiling: big tiles hide DMA latency; small B falls back to one tile
    # (block == full array dims, so no (8,128) alignment issue).
    tb = min(block_b, B)
    n_tiles = pl.cdiv(B, tb)
    Bp = n_tiles * tb
    if Bp != B:
        pad = Bp - B
        x = jnp.pad(x, ((0, pad), (0, 0)))
        y = jnp.pad(y, ((0, pad), (0, 0)))

    out = pl.pallas_call(
        mine_kernel,
        out_shape=jax.ShapeDtypeStruct((Bp, 1), jnp.float32),
        grid=(n_tiles,),
        in_specs=[
            # Activations stream tile-by-tile over the batch grid.
            pl.BlockSpec((tb, Dx), lambda i: (i, 0)),
            pl.BlockSpec((tb, Dy), lambda i: (i, 0)),
            # Weights/biases: constant block index -> VMEM-resident, no re-DMA.
            pl.BlockSpec((Dx, H), lambda i: (0, 0)),
            pl.BlockSpec((Dy, H), lambda i: (0, 0)),
            pl.BlockSpec((1, H), lambda i: (0, 0)),
            pl.BlockSpec((1, H), lambda i: (0, 0)),
            # Scalar bias b2 in SMEM (no VMEM buffer pair needed).
            pl.BlockSpec(memory_space=pltpu.MemorySpace.SMEM),
        ],
        out_specs=pl.BlockSpec((tb, 1), lambda i: (i, 0)),
        compiler_params=pltpu.CompilerParams(
            dimension_semantics=("parallel",),
        ),
    )(x, y, w1x, w1y, b1_2d, w2_row, b2_2d)

    return out[:B]


def init_params(key, input_dim, hidden_dim):
    """Deterministic init mimicking torch.nn.Linear (uniform +/- 1/sqrt(fan_in)),
    but weights stored as (in, out) for the kernel."""
    k1, k2, k3, k4 = jax.random.split(key, 4)
    lim1 = 1.0 / jnp.sqrt(input_dim)
    lim2 = 1.0 / jnp.sqrt(hidden_dim)
    w1 = jax.random.uniform(k1, (input_dim, hidden_dim), jnp.float32, -lim1, lim1)
    b1 = jax.random.uniform(k2, (hidden_dim,), jnp.float32, -lim1, lim1)
    w2 = jax.random.uniform(k3, (hidden_dim, 1), jnp.float32, -lim2, lim2)
    b2 = jax.random.uniform(k4, (1,), jnp.float32, -lim2, lim2)
    return w1, b1, w2, b2


if __name__ == "__main__":
    # MXU/lane-aligned feature dims (Dx=Dy=64 -> D=128, H=128); B=1000 with
    # block_b=512 exercises the batch grid (2 tiles) plus the padding path.
    B, DX, DY, HID = 1000, 64, 64, 128
    INPUT_DIM = DX + DY

    key = jax.random.PRNGKey(0)
    kx, ky, kp = jax.random.split(key, 3)
    x = jax.random.normal(kx, (B, DX), jnp.float32)
    y = jax.random.normal(ky, (B, DY), jnp.float32)
    w1, b1, w2, b2 = init_params(kp, INPUT_DIM, HID)

    out = mine_forward(x, y, w1, b1, w2, b2, block_b=512)
    out = jax.block_until_ready(out)

    # Reference check in plain JAX (f32 end-to-end).
    h = jnp.concatenate([x, y], axis=-1)
    ref = jnp.maximum(h @ w1 + b1, 0.0) @ w2 + b2
    assert out.shape == (B, 1)
    assert jnp.allclose(out, ref, atol=1e-4, rtol=1e-4)

    print("KERNEL_OK")
</pallas_src>

<mosaic_0001>
module attributes {stable_mosaic.version = 11 : i64} {
  func.func @mine_kernel(%arg0: i32, %arg1: memref<512x64xf32, #tpu.memory_space<vmem>>, %arg2: memref<512x64xf32, #tpu.memory_space<vmem>>, %arg3: memref<64x128xf32, #tpu.memory_space<vmem>>, %arg4: memref<64x128xf32, #tpu.memory_space<vmem>>, %arg5: memref<1x128xf32, #tpu.memory_space<vmem>>, %arg6: memref<1x128xf32, #tpu.memory_space<vmem>>, %arg7: memref<1x1xf32, #tpu.memory_space<smem>>, %arg8: memref<512x1xf32, #tpu.memory_space<vmem>>) attributes {dimension_semantics = [#tpu.dimension_semantics<parallel>], iteration_bounds = array<i64: 2>, scalar_prefetch = 0 : i64, scratch_operands = 0 : i64, tpu.core_type = #tpu.core_type<tc>, window_params = [{transform_indices = @transform_0, window_bounds = array<i64: 512, 64>}, {transform_indices = @transform_1, window_bounds = array<i64: 512, 64>}, {pipeline_mode = #tpu.pipeline_mode<synchronous>, transform_indices = @transform_2, window_bounds = array<i64: 64, 128>}, {pipeline_mode = #tpu.pipeline_mode<synchronous>, transform_indices = @transform_3, window_bounds = array<i64: 64, 128>}, {pipeline_mode = #tpu.pipeline_mode<synchronous>, transform_indices = @transform_4, window_bounds = array<i64: 1, 128>}, {pipeline_mode = #tpu.pipeline_mode<synchronous>, transform_indices = @transform_5, window_bounds = array<i64: 1, 128>}, {transform_indices = @transform_6, window_bounds = array<i64: 1, 1>}, {transform_indices = @transform_7, window_bounds = array<i64: 512, 1>}]} {
    %c0 = arith.constant 0 : index
    %c0_0 = arith.constant 0 : index
    %0 = vector.load %arg1[%c0, %c0_0] : memref<512x64xf32, #tpu.memory_space<vmem>>, vector<512x64xf32>
    %c0_1 = arith.constant 0 : index
    %c0_2 = arith.constant 0 : index
    %1 = vector.load %arg2[%c0_1, %c0_2] : memref<512x64xf32, #tpu.memory_space<vmem>>, vector<512x64xf32>
    %c0_3 = arith.constant 0 : index
    %c0_4 = arith.constant 0 : index
    %2 = vector.load %arg3[%c0_3, %c0_4] : memref<64x128xf32, #tpu.memory_space<vmem>>, vector<64x128xf32>
    %cst = arith.constant dense<0.000000e+00> : vector<512x128xf32>
    %3 = tpu.matmul %0, %2, %cst {dimension_numbers = #tpu.dot_dimension_numbers<[1], [0], [0], [1], [0, 0, 1, 1], [], []>} : vector<512x64xf32>, vector<64x128xf32>, vector<512x128xf32> -> vector<512x128xf32>
    %c0_5 = arith.constant 0 : index
    %c0_6 = arith.constant 0 : index
    %4 = vector.load %arg4[%c0_5, %c0_6] : memref<64x128xf32, #tpu.memory_space<vmem>>, vector<64x128xf32>
    %cst_7 = arith.constant dense<0.000000e+00> : vector<512x128xf32>
    %5 = tpu.matmul %1, %4, %cst_7 {dimension_numbers = #tpu.dot_dimension_numbers<[1], [0], [0], [1], [0, 0, 1, 1], [], []>} : vector<512x64xf32>, vector<64x128xf32>, vector<512x128xf32> -> vector<512x128xf32>
    %6 = arith.addf %3, %5 : vector<512x128xf32>
    %c0_8 = arith.constant 0 : index
    %c0_9 = arith.constant 0 : index
    %7 = vector.load %arg5[%c0_8, %c0_9] : memref<1x128xf32, #tpu.memory_space<vmem>>, vector<1x128xf32>
    %8 = vector.broadcast %7 : vector<1x128xf32> to vector<512x128xf32>
    %9 = arith.addf %6, %8 : vector<512x128xf32>
    %cst_10 = arith.constant 0.000000e+00 : f32
    %10 = vector.broadcast %cst_10 : f32 to vector<512x128xf32>
    %11 = arith.maximumf %9, %10 : vector<512x128xf32>
    %c0_11 = arith.constant 0 : index
    %c0_12 = arith.constant 0 : index
    %12 = vector.load %arg6[%c0_11, %c0_12] : memref<1x128xf32, #tpu.memory_space<vmem>>, vector<1x128xf32>
    %13 = vector.broadcast %12 : vector<1x128xf32> to vector<512x128xf32>
    %14 = arith.mulf %11, %13 : vector<512x128xf32>
    %cst_13 = arith.constant dense<0.000000e+00> : vector<512xf32>
    %15 = vector.multi_reduction <add>, %14, %cst_13 [1] : vector<512x128xf32> to vector<512xf32>
    %16 = vector.shape_cast %15 : vector<512xf32> to vector<512x1xf32>
    %c0_14 = arith.constant 0 : index
    %c0_15 = arith.constant 0 : index
    %17 = memref.load %arg7[%c0_14, %c0_15] : memref<1x1xf32, #tpu.memory_space<smem>>
    %18 = vector.broadcast %17 : f32 to vector<512x1xf32>
    %19 = arith.addf %16, %18 : vector<512x1xf32>
    %c0_16 = arith.constant 0 : index
    %c0_17 = arith.constant 0 : index
    %20 = vector.load %arg8[%c0_16, %c0_17] : memref<512x1xf32, #tpu.memory_space<vmem>>, vector<512x1xf32>
    tpu.vector_store %arg8[%c0_16, %c0_17], %19 {strides = array<i32>} : memref<512x1xf32, #tpu.memory_space<vmem>>, vector<512x1xf32>,
    return
  }
  func.func @transform_0(%arg0: i32) -> (i32, i32) {
    %c0_i32 = arith.constant 0 : i32
    %c0_i32_0 = arith.constant 0 : i32
    return %arg0, %c0_i32 : i32, i32
  }
  func.func @transform_1(%arg0: i32) -> (i32, i32) {
    %c0_i32 = arith.constant 0 : i32
    %c0_i32_0 = arith.constant 0 : i32
    return %arg0, %c0_i32 : i32, i32
  }
  func.func @transform_2(%arg0: i32) -> (i32, i32) {
    %c0_i32 = arith.constant 0 : i32
    %c0_i32_0 = arith.constant 0 : i32
    %c0_i32_1 = arith.constant 0 : i32
    return %c0_i32, %c0_i32_0 : i32, i32
  }
  func.func @transform_3(%arg0: i32) -> (i32, i32) {
    %c0_i32 = arith.constant 0 : i32
    %c0_i32_0 = arith.constant 0 : i32
    %c0_i32_1 = arith.constant 0 : i32
    return %c0_i32, %c0_i32_0 : i32, i32
  }
  func.func @transform_4(%arg0: i32) -> (i32, i32) {
    %c0_i32 = arith.constant 0 : i32
    %c0_i32_0 = arith.constant 0 : i32
    %c0_i32_1 = arith.constant 0 : i32
    return %c0_i32, %c0_i32_0 : i32, i32
  }
  func.func @transform_5(%arg0: i32) -> (i32, i32) {
    %c0_i32 = arith.constant 0 : i32
    %c0_i32_0 = arith.constant 0 : i32
    %c0_i32_1 = arith.constant 0 : i32
    return %c0_i32, %c0_i32_0 : i32, i32
  }
  func.func @transform_6(%arg0: i32) -> (i32, i32) {
    %c0_i32 = arith.constant 0 : i32
    %c0_i32_0 = arith.constant 0 : i32
    %c0_i32_1 = arith.constant 0 : i32
    return %c0_i32, %c0_i32_0 : i32, i32
  }
  func.func @transform_7(%arg0: i32) -> (i32, i32) {
    %c0_i32 = arith.constant 0 : i32
    %c0_i32_0 = arith.constant 0 : i32
    return %arg0, %c0_i32 : i32, i32
  }
}

</mosaic_0001>

<bundles_post_ra>
// kernel: tpu_custom_call.1
= control target key start
LH: loop header
LB: loop body
LE: loop exit
PB: predicated region body
PF: predicated region fallthrough
CT: control target
= control target key end

     0   :  { %s2803_s26 = smov 0   ;;  %s3470_s0 = inlined_call_operand.vmem [shape: f32[1024,64], index: 0, kind: input, shape index: {}]   ;;  %s3471_s1 = inlined_call_operand.vmem [shape: f32[1024,64], index: 1, kind: input, shape index: {}]   ;;  %s3472_s2 = inlined_call_operand.vmem [shape: f32[64,128], index: 2, kind: input, shape index: {}]   ;;  %s3473_s3 = inlined_call_operand.vmem [shape: f32[64,128], index: 3, kind: input, shape index: {}]   ;;  %s3474_s4 = inlined_call_operand.vmem [shape: f32[1,128], index: 4, kind: input, shape index: {}]   ;;  %s3475_s5 = inlined_call_operand.vmem [shape: f32[1,128], index: 5, kind: input, shape index: {}]   ;;  %s3476_s6 = inlined_call_operand.<no memory space> [shape: f32[1,1], index: 6, kind: input, shape index: {}]   ;;  %s3477_s7 = inlined_call_operand.vmem [shape: f32[1024,1], index: 7, kind: output, shape index: {}]  }
   0x1   :  { %12 = sst [smem:[#allocation2]] %s3476_s6 }
   0x2 LB: > { %s2137_s27 = sadd.s32 4294967295, %s2758_s26   ;;  %p2141_p0 = scmp.ge.s32.totalorder %s2758_s26, 1  ;;  %s2758_s26 = sphi %s2803_s26, %s18_s26  }
   0x3   : > { %p250_p1 = scmp.lt.s32.totalorder %s2758_s26, 3 }
   0x5   : > { %p251_p2 = pnand %p2141_p0, %p250_p1 }
   0x6   : > { %v441_v0 = vld [vmem:[%s3473_s3] sm:$0xff] (!%p251_p2)  ;;  %v442_v1 = vld [vmem:[%s3473_s3 + $0x8] sm:$0xff] (!%p251_p2)  ;;  %s2142_s10 = sshll.u32 (!%p251_p2), %s2137_s27, 6  ;;  %v443_v5 = vld [vmem:[%s3473_s3 + $0x10] sm:$0xff] (!%p251_p2)  ;;  %vm449_vm0 = vcmask (!%p251_p2), 523264   ;;  %s1938_s25 = sld [smem:[#allocation2]] (!%p251_p2) }
   0x7   : > { %254 = sbr.rel (%p251_p2) target bundleno = 519 (0x207), region = 48  ;;  %v433_v2 = vld [vmem:[%s3472_s2] sm:$0xff] (!%p251_p2)  ;;  %v2648_v3 = vpack.c.bf16 (!%p251_p2), %v442_v1, %v441_v0  ;;  %v434_v4 = vld [vmem:[%s3472_s2 + $0x8] sm:$0xff] (!%p251_p2)  ;;  %v444_v6 = vld [vmem:[%s3473_s3 + $0x18] sm:$0xff] (!%p251_p2)  ;;  %p288_p3 = scmp.lt.s32.totalorder (!%p251_p2), %s2142_s10, 127  ;;  %vm2004_vm1 = vcmask (!%p251_p2), 7168  }
   0x8   : > { %v2664_v7 = vpack.c.bf16 (!%p251_p2), %v434_v4, %v433_v2  ;;  %v2652_v8 = vpack.c.bf16 (!%p251_p2), %v444_v6, %v443_v5  ;;  %v435_v9 = vld [vmem:[%s3472_s2 + $0x10] sm:$0xff] (!%p251_p2)  ;;  %v436_v10 = vld [vmem:[%s3472_s2 + $0x18] sm:$0xff] (!%p251_p2)  ;;  %v445_v11 = vld [vmem:[%s3473_s3 + $0x20] sm:$0xff] (!%p251_p2) }
   0x9   : > { %2649 = vmatprep.subr.bf16.mxu1 (!%p251_p2), %v2648_v3  ;;  %v2668_v12 = vpack.c.bf16 (!%p251_p2), %v436_v10, %v435_v9  ;;  %v446_v13 = vld [vmem:[%s3473_s3 + $0x28] sm:$0xff] (!%p251_p2)  ;;  %v437_v14 = vld [vmem:[%s3472_s2 + $0x20] sm:$0xff] (!%p251_p2)  ;;  %v447_v18 = vld [vmem:[%s3473_s3 + $0x30] sm:$0xff] (!%p251_p2) }
   0xa   : > { %v438_v15 = vld [vmem:[%s3472_s2 + $0x28] sm:$0xff] (!%p251_p2)  ;;  %2665 = vmatprep.subr.bf16.mxu0 (!%p251_p2), %v2664_v7  ;;  %2651 = vmatpush3.bf16.msra.mxu1 (!%p251_p2), %v2648_v3  ;;  %v2656_v16 = vpack.c.bf16 (!%p251_p2), %v446_v13, %v445_v11  ;;  %v448_v19 = vld [vmem:[%s3473_s3 + $0x38] sm:$0xff] (!%p251_p2)  ;;  %v439_v20 = vld [vmem:[%s3472_s2 + $0x30] sm:$0xff] (!%p251_p2) }
   0xb   : > { %2667 = vmatpush3.bf16.msra.mxu0 (!%p251_p2), %v2664_v7  ;;  %2653 = vmatprep.subr.bf16.mxu1 (!%p251_p2), %v2652_v8  ;;  %v2672_v17 = vpack.c.bf16 (!%p251_p2), %v438_v15, %v437_v14  ;;  %v440_v21 = vld [vmem:[%s3472_s2 + $0x38] sm:$0xff] (!%p251_p2)  ;;  %v2660_v24 = vpack.c.bf16 (!%p251_p2), %v448_v19, %v447_v18 }
   0xc   : > { %2669 = vmatprep.subr.bf16.mxu0 (!%p251_p2), %v2668_v12  ;;  %v2676_v25 = vpack.c.bf16 (!%p251_p2), %v440_v21, %v439_v20 }
   0xe   : > { %s3479_s10 = smov (!%p288_p3, %s2142_s10), 127  ;;  %2655 = vmatpush3.bf16.msra.mxu1 %v2652_v8 }
   0xf   : > { %s2847_s6 = sshll.u32 %s3479_s10, 3  ;;  %2671 = vmatpush3.bf16.msra.mxu0 %v2668_v12  ;;  %2657 = vmatprep.subr.bf16.mxu1 %v2656_v16 }
  0x10   : > { %s2862_s15 = scalar_lea.vmem %s3471_s1, %s2847_s6  ;;  %s2868_s18 = scalar_lea.vmem %s3470_s0, %s2847_s6  ;;  %2673 = vmatprep.subr.bf16.mxu0 %v2672_v17 }
  0x11   : > { %v369_v22 = vld [vmem:[%s2862_s15] sm:$0xff]  ;;  %v370_v26 = vld [vmem:[%s2862_s15 + $0x8] sm:$0xff]  ;;  %v371_v28 = vld [vmem:[%s2862_s15 + $0x10] sm:$0xff]  ;;  %s3273_s29 = scalar_lea.vmem %s3477_s7, %s2847_s6 }
  0x12   : > { %v305_v23 = vld [vmem:[%s2868_s18] sm:$0xff]  ;;  %2440 = vmatprep.mubr.msk.f32.mxu1 %vm449_vm0, %v369_v22  ;;  %2659 = vmatpush3.bf16.msra.mxu1 %v2656_v16  ;;  %v306_v27 = vld [vmem:[%s2868_s18 + $0x8] sm:$0xff]  ;;  %v307_v29 = vld [vmem:[%s2868_s18 + $0x10] sm:$0xff] }
  0x13   : > { %2552 = vmatprep.mubr.msk.f32.mxu0 %vm449_vm0, %v305_v23  ;;  %2675 = vmatpush3.bf16.msra.mxu0 %v2672_v17  ;;  %v372_v30 = vld [vmem:[%s2862_s15 + $0x18] sm:$0xff]  ;;  %v373_v32 = vld [vmem:[%s2862_s15 + $0x20] sm:$0xff]  ;;  %v374_v34 = vld [vmem:[%s2862_s15 + $0x28] sm:$0xff] }
  0x14   : > { %2661 = vmatprep.subr.bf16.mxu1 %v2660_v24  ;;  %2677 = vmatprep.subr.bf16.mxu0 %v2676_v25  ;;  %v308_v31 = vld [vmem:[%s2868_s18 + $0x18] sm:$0xff]  ;;  %v309_v33 = vld [vmem:[%s2868_s18 + $0x20] sm:$0xff]  ;;  %v310_v35 = vld [vmem:[%s2868_s18 + $0x28] sm:$0xff] }
  0x15   : > { %v375_v36 = vld [vmem:[%s2862_s15 + $0x30] sm:$0xff]  ;;  %v376_v38 = vld [vmem:[%s2862_s15 + $0x38] sm:$0xff]  ;;  %v377_v40 = vld [vmem:[%s2862_s15 + $0x40] sm:$0xff] }
  0x16   : > { %2663 = vmatpush3.bf16.msra.mxu1 %v2660_v24  ;;  %v311_v37 = vld [vmem:[%s2868_s18 + $0x30] sm:$0xff]  ;;  %v312_v39 = vld [vmem:[%s2868_s18 + $0x38] sm:$0xff]  ;;  %v313_v41 = vld [vmem:[%s2868_s18 + $0x40] sm:$0xff] }
  0x17   : > { %2679 = vmatpush3.bf16.msra.mxu0 %v2676_v25  ;;  %v378_v42 = vld [vmem:[%s2862_s15 + $0x48] sm:$0xff]  ;;  %v379_v44 = vld [vmem:[%s2862_s15 + $0x50] sm:$0xff]  ;;  %v380_v46 = vld [vmem:[%s2862_s15 + $0x58] sm:$0xff] }
  0x18   : > { %v314_v43 = vld [vmem:[%s2868_s18 + $0x48] sm:$0xff]  ;;  %v315_v45 = vld [vmem:[%s2868_s18 + $0x50] sm:$0xff]  ;;  %v316_v47 = vld [vmem:[%s2868_s18 + $0x58] sm:$0xff] }
  0x19   : > { %2441 = vmatmul.mubr.msk.f32.vlgmr.msra.gmra.mrb[0].mxu1 %vm449_vm0, %v370_v26  ;;  %v381_v48 = vld [vmem:[%s2862_s15 + $0x60] sm:$0xff]  ;;  %v382_v50 = vld [vmem:[%s2862_s15 + $0x68] sm:$0xff]  ;;  %v383_v52 = vld [vmem:[%s2862_s15 + $0x70] sm:$0xff] }
  0x1a   : > { %2553 = vmatmul.mubr.msk.f32.vlgmr.msra.gmra.mrb[0].mxu0 %vm449_vm0, %v306_v27  ;;  %2443 = vmatprep.mubr.msk.f32.mxu1 %vm449_vm0, %v371_v28  ;;  %v317_v49 = vld [vmem:[%s2868_s18 + $0x60] sm:$0xff]  ;;  %v318_v51 = vld [vmem:[%s2868_s18 + $0x68] sm:$0xff]  ;;  %v319_v53 = vld [vmem:[%s2868_s18 + $0x70] sm:$0xff] }
  0x1b   : > { %2555 = vmatprep.mubr.msk.f32.mxu0 %vm449_vm0, %v307_v29  ;;  %v384_v54 = vld [vmem:[%s2862_s15 + $0x78] sm:$0xff]  ;;  %v385_v56 = vld [vmem:[%s2862_s15 + $0x80] sm:$0xff]  ;;  %v386_v58 = vld [vmem:[%s2862_s15 + $0x88] sm:$0xff] }
  0x1c   : > { %v320_v55 = vld [vmem:[%s2868_s18 + $0x78] sm:$0xff]  ;;  %v321_v57 = vld [vmem:[%s2868_s18 + $0x80] sm:$0xff]  ;;  %v322_v59 = vld [vmem:[%s2868_s18 + $0x88] sm:$0xff] }
  0x1d   : > { %2444 = vmatmul.mubr.msk.f32.gmra.mrb[2].mxu1 %vm449_vm0, %v372_v30  ;;  %v387_v60 = vld [vmem:[%s2862_s15 + $0x90] sm:$0xff]  ;;  %v388_v62 = vld [vmem:[%s2862_s15 + $0x98] sm:$0xff]  ;;  %v389_v0 = vld [vmem:[%s2862_s15 + $0xa0] sm:$0xff] }
  0x1e   : > { %2556 = vmatmul.mubr.msk.f32.gmra.mrb[2].mxu0 %vm449_vm0, %v308_v31  ;;  %2446 = vmatprep.mubr.msk.f32.mxu1 %vm449_vm0, %v373_v32  ;;  %v323_v61 = vld [vmem:[%s2868_s18 + $0x90] sm:$0xff]  ;;  %v324_v63 = vld [vmem:[%s2868_s18 + $0x98] sm:$0xff]  ;;  %v325_v1 = vld [vmem:[%s2868_s18 + $0xa0] sm:$0xff] }
  0x1f   : > { %2558 = vmatprep.mubr.msk.f32.mxu0 %vm449_vm0, %v309_v33  ;;  %v390_v2 = vld [vmem:[%s2862_s15 + $0xa8] sm:$0xff]  ;;  %v391_v4 = vld [vmem:[%s2862_s15 + $0xb0] sm:$0xff]  ;;  %v392_v6 = vld [vmem:[%s2862_s15 + $0xb8] sm:$0xff] }
  0x20   : > { %v326_v3 = vld [vmem:[%s2868_s18 + $0xa8] sm:$0xff]  ;;  %v327_v5 = vld [vmem:[%s2868_s18 + $0xb0] sm:$0xff]  ;;  %v328_v7 = vld [vmem:[%s2868_s18 + $0xb8] sm:$0xff] }
  0x21   : > { %2447 = vmatmul.mubr.msk.f32.gmra.mrb[4].mxu1 %vm449_vm0, %v374_v34  ;;  %v393_v8 = vld [vmem:[%s2862_s15 + $0xc0] sm:$0xff]  ;;  %v394_v10 = vld [vmem:[%s2862_s15 + $0xc8] sm:$0xff]  ;;  %v395_v12 = vld [vmem:[%s2862_s15 + $0xd0] sm:$0xff] }
  0x22   : > { %2559 = vmatmul.mubr.msk.f32.gmra.mrb[4].mxu0 %vm449_vm0, %v310_v35  ;;  %2449 = vmatprep.mubr.msk.f32.mxu1 %vm449_vm0, %v375_v36  ;;  %v329_v9 = vld [vmem:[%s2868_s18 + $0xc0] sm:$0xff]  ;;  %v330_v11 = vld [vmem:[%s2868_s18 + $0xc8] sm:$0xff]  ;;  %v331_v13 = vld [vmem:[%s2868_s18 + $0xd0] sm:$0xff] }
  0x23   : > { %2561 = vmatprep.mubr.msk.f32.mxu0 %vm449_vm0, %v311_v37  ;;  %v396_v14 = vld [vmem:[%s2862_s15 + $0xd8] sm:$0xff]  ;;  %v397_v16 = vld [vmem:[%s2862_s15 + $0xe0] sm:$0xff]  ;;  %v398_v18 = vld [vmem:[%s2862_s15 + $0xe8] sm:$0xff] }
  0x24   : > { %v332_v15 = vld [vmem:[%s2868_s18 + $0xd8] sm:$0xff]  ;;  %v333_v17 = vld [vmem:[%s2868_s18 + $0xe0] sm:$0xff]  ;;  %v334_v19 = vld [vmem:[%s2868_s18 + $0xe8] sm:$0xff] }
  0x25   : > { %2450 = vmatmul.mubr.msk.f32.gmra.mrb[6].mxu1 %vm449_vm0, %v376_v38  ;;  %v399_v20 = vld [vmem:[%s2862_s15 + $0xf0] sm:$0xff]  ;;  %v400_v22 = vld [vmem:[%s2862_s15 + $0xf8] sm:$0xff]  ;;  %v401_v24 = vld [vmem:[%s2862_s15 + $0x100] sm:$0xff] }
  0x26   : > { %2562 = vmatmul.mubr.msk.f32.gmra.mrb[6].mxu0 %vm449_vm0, %v312_v39  ;;  %2452 = vmatprep.mubr.msk.f32.mxu1 %vm449_vm0, %v377_v40  ;;  %v335_v21 = vld [vmem:[%s2868_s18 + $0xf0] sm:$0xff]  ;;  %v336_v23 = vld [vmem:[%s2868_s18 + $0xf8] sm:$0xff]  ;;  %v337_v25 = vld [vmem:[%s2868_s18 + $0x100] sm:$0xff] }
  0x27   : > { %2564 = vmatprep.mubr.msk.f32.mxu0 %vm449_vm0, %v313_v41  ;;  %v402_v26 = vld [vmem:[%s2862_s15 + $0x108] sm:$0xff]  ;;  %v403_v28 = vld [vmem:[%s2862_s15 + $0x110] sm:$0xff]  ;;  %v404_v30 = vld [vmem:[%s2862_s15 + $0x118] sm:$0xff] }
  0x28   : > { %v338_v27 = vld [vmem:[%s2868_s18 + $0x108] sm:$0xff]  ;;  %v339_v29 = vld [vmem:[%s2868_s18 + $0x110] sm:$0xff]  ;;  %v340_v31 = vld [vmem:[%s2868_s18 + $0x118] sm:$0xff] }
  0x29   : > { %2453 = vmatmul.mubr.msk.f32.gmra.mrb[8].mxu1 %vm449_vm0, %v378_v42  ;;  %v405_v32 = vld [vmem:[%s2862_s15 + $0x120] sm:$0xff]  ;;  %v406_v34 = vld [vmem:[%s2862_s15 + $0x128] sm:$0xff]  ;;  %v407_v36 = vld [vmem:[%s2862_s15 + $0x130] sm:$0xff] }
  0x2a   : > { %2565 = vmatmul.mubr.msk.f32.gmra.mrb[8].mxu0 %vm449_vm0, %v314_v43  ;;  %2455 = vmatprep.mubr.msk.f32.mxu1 %vm449_vm0, %v379_v44  ;;  %v341_v33 = vld [vmem:[%s2868_s18 + $0x120] sm:$0xff]  ;;  %v342_v35 = vld [vmem:[%s2868_s18 + $0x128] sm:$0xff]  ;;  %v343_v37 = vld [vmem:[%s2868_s18 + $0x130] sm:$0xff] }
  0x2b   : > { %2567 = vmatprep.mubr.msk.f32.mxu0 %vm449_vm0, %v315_v45  ;;  %v408_v38 = vld [vmem:[%s2862_s15 + $0x138] sm:$0xff]  ;;  %v409_v40 = vld [vmem:[%s2862_s15 + $0x140] sm:$0xff]  ;;  %v410_v42 = vld [vmem:[%s2862_s15 + $0x148] sm:$0xff] }
  0x2c   : > { %v344_v39 = vld [vmem:[%s2868_s18 + $0x138] sm:$0xff]  ;;  %v345_v41 = vld [vmem:[%s2868_s18 + $0x140] sm:$0xff]  ;;  %v346_v43 = vld [vmem:[%s2868_s18 + $0x148] sm:$0xff] }
  0x2d   : > { %2456 = vmatmul.mubr.msk.f32.gmra.mrb[10].mxu1 %vm449_vm0, %v380_v46  ;;  %v411_v44 = vld [vmem:[%s2862_s15 + $0x150] sm:$0xff]  ;;  %v412_v46 = vld [vmem:[%s2862_s15 + $0x158] sm:$0xff] }
  0x2e   : > { %2568 = vmatmul.mubr.msk.f32.gmra.mrb[10].mxu0 %vm449_vm0, %v316_v47  ;;  %2458 = vmatprep.mubr.msk.f32.mxu1 %vm449_vm0, %v381_v48  ;;  %v347_v45 = vld [vmem:[%s2868_s18 + $0x150] sm:$0xff]  ;;  %v348_v47 = vld [vmem:[%s2868_s18 + $0x158] sm:$0xff]  ;;  %v413_v48 = vld [vmem:[%s2862_s15 + $0x160] sm:$0xff] }
  0x2f   : > { %2570 = vmatprep.mubr.msk.f32.mxu0 %vm449_vm0, %v317_v49  ;;  %v349_v49 = vld [vmem:[%s2868_s18 + $0x160] sm:$0xff] }
  0x31   : > { %2459 = vmatmul.mubr.msk.f32.gmra.mrb[12].mxu1 %vm449_vm0, %v382_v50  ;;  %v414_v50 = vld [vmem:[%s2862_s15 + $0x168] sm:$0xff] }
  0x32   : > { %2571 = vmatmul.mubr.msk.f32.gmra.mrb[12].mxu0 %vm449_vm0, %v318_v51  ;;  %2461 = vmatprep.mubr.msk.f32.mxu1 %vm449_vm0, %v383_v52  ;;  %v350_v51 = vld [vmem:[%s2868_s18 + $0x168] sm:$0xff]  ;;  %v415_v52 = vld [vmem:[%s2862_s15 + $0x170] sm:$0xff] }
  0x33   : > { %2573 = vmatprep.mubr.msk.f32.mxu0 %vm449_vm0, %v319_v53  ;;  %v351_v53 = vld [vmem:[%s2868_s18 + $0x170] sm:$0xff] }
  0x35   : > { %2462 = vmatmul.mubr.msk.f32.gmra.mrb[14].mxu1 %vm449_vm0, %v384_v54  ;;  %v416_v54 = vld [vmem:[%s2862_s15 + $0x178] sm:$0xff] }
  0x36   : > { %2574 = vmatmul.mubr.msk.f32.gmra.mrb[14].mxu0 %vm449_vm0, %v320_v55  ;;  %2464 = vmatprep.mubr.msk.f32.mxu1 %vm449_vm0, %v385_v56  ;;  %v352_v55 = vld [vmem:[%s2868_s18 + $0x178] sm:$0xff]  ;;  %v417_v56 = vld [vmem:[%s2862_s15 + $0x180] sm:$0xff] }
  0x37   : > { %2576 = vmatprep.mubr.msk.f32.mxu0 %vm449_vm0, %v321_v57  ;;  %v353_v57 = vld [vmem:[%s2868_s18 + $0x180] sm:$0xff] }
  0x39   : > { %2465 = vmatmul.mubr.msk.f32.gmra.mrb[16].mxu1 %vm449_vm0, %v386_v58  ;;  %v418_v58 = vld [vmem:[%s2862_s15 + $0x188] sm:$0xff] }
  0x3a   : > { %2577 = vmatmul.mubr.msk.f32.gmra.mrb[16].mxu0 %vm449_vm0, %v322_v59  ;;  %2467 = vmatprep.mubr.msk.f32.mxu1 %vm449_vm0, %v387_v60  ;;  %v354_v59 = vld [vmem:[%s2868_s18 + $0x188] sm:$0xff]  ;;  %v419_v60 = vld [vmem:[%s2862_s15 + $0x190] sm:$0xff] }
  0x3b   : > { %2579 = vmatprep.mubr.msk.f32.mxu0 %vm449_vm0, %v323_v61  ;;  %v355_v61 = vld [vmem:[%s2868_s18 + $0x190] sm:$0xff] }
  0x3d   : > { %2468 = vmatmul.mubr.msk.f32.gmra.mrb[18].mxu1 %vm449_vm0, %v388_v62  ;;  %v420_v62 = vld [vmem:[%s2862_s15 + $0x198] sm:$0xff] }
  0x3e   : > { %2580 = vmatmul.mubr.msk.f32.gmra.mrb[18].mxu0 %vm449_vm0, %v324_v63  ;;  %2470 = vmatprep.mubr.msk.f32.mxu1 %vm449_vm0, %v389_v0  ;;  %v356_v63 = vld [vmem:[%s2868_s18 + $0x198] sm:$0xff]  ;;  %v421_v0 = vld [vmem:[%s2862_s15 + $0x1a0] sm:$0xff] }
  0x3f   : > { %2582 = vmatprep.mubr.msk.f32.mxu0 %vm449_vm0, %v325_v1  ;;  %v357_v1 = vld [vmem:[%s2868_s18 + $0x1a0] sm:$0xff] }
  0x41   : > { %2471 = vmatmul.mubr.msk.f32.gmra.mrb[20].mxu1 %vm449_vm0, %v390_v2  ;;  %v422_v2 = vld [vmem:[%s2862_s15 + $0x1a8] sm:$0xff] }
  0x42   : > { %2583 = vmatmul.mubr.msk.f32.gmra.mrb[20].mxu0 %vm449_vm0, %v326_v3  ;;  %2473 = vmatprep.mubr.msk.f32.mxu1 %vm449_vm0, %v391_v4  ;;  %v358_v3 = vld [vmem:[%s2868_s18 + $0x1a8] sm:$0xff]  ;;  %v423_v4 = vld [vmem:[%s2862_s15 + $0x1b0] sm:$0xff] }
  0x43   : > { %2585 = vmatprep.mubr.msk.f32.mxu0 %vm449_vm0, %v327_v5  ;;  %v359_v5 = vld [vmem:[%s2868_s18 + $0x1b0] sm:$0xff] }
  0x45   : > { %2474 = vmatmul.mubr.msk.f32.gmra.mrb[22].mxu1 %vm449_vm0, %v392_v6  ;;  %v424_v6 = vld [vmem:[%s2862_s15 + $0x1b8] sm:$0xff] }
  0x46   : > { %2586 = vmatmul.mubr.msk.f32.gmra.mrb[22].mxu0 %vm449_vm0, %v328_v7  ;;  %2476 = vmatprep.mubr.msk.f32.mxu1 %vm449_vm0, %v393_v8  ;;  %v360_v7 = vld [vmem:[%s2868_s18 + $0x1b8] sm:$0xff]  ;;  %v425_v8 = vld [vmem:[%s2862_s15 + $0x1c0] sm:$0xff] }
  0x47   : > { %2588 = vmatprep.mubr.msk.f32.mxu0 %vm449_vm0, %v329_v9  ;;  %v361_v9 = vld [vmem:[%s2868_s18 + $0x1c0] sm:$0xff] }
  0x49   : > { %2477 = vmatmul.mubr.msk.f32.gmra.mrb[24].mxu1 %vm449_vm0, %v394_v10  ;;  %v426_v10 = vld [vmem:[%s2862_s15 + $0x1c8] sm:$0xff] }
  0x4a   : > { %2589 = vmatmul.mubr.msk.f32.gmra.mrb[24].mxu0 %vm449_vm0, %v330_v11  ;;  %2479 = vmatprep.mubr.msk.f32.mxu1 %vm449_vm0, %v395_v12  ;;  %v362_v11 = vld [vmem:[%s2868_s18 + $0x1c8] sm:$0xff]  ;;  %v427_v12 = vld [vmem:[%s2862_s15 + $0x1d0] sm:$0xff] }
  0x4b   : > { %2591 = vmatprep.mubr.msk.f32.mxu0 %vm449_vm0, %v331_v13  ;;  %v363_v13 = vld [vmem:[%s2868_s18 + $0x1d0] sm:$0xff] }
  0x4d   : > { %2480 = vmatmul.mubr.msk.f32.gmra.mrb[26].mxu1 %vm449_vm0, %v396_v14  ;;  %v428_v14 = vld [vmem:[%s2862_s15 + $0x1d8] sm:$0xff] }
  0x4e   : > { %2592 = vmatmul.mubr.msk.f32.gmra.mrb[26].mxu0 %vm449_vm0, %v332_v15  ;;  %2482 = vmatprep.mubr.msk.f32.mxu1 %vm449_vm0, %v397_v16  ;;  %v364_v15 = vld [vmem:[%s2868_s18 + $0x1d8] sm:$0xff]  ;;  %v429_v16 = vld [vmem:[%s2862_s15 + $0x1e0] sm:$0xff] }
  0x4f   : > { %2594 = vmatprep.mubr.msk.f32.mxu0 %vm449_vm0, %v333_v17  ;;  %v365_v17 = vld [vmem:[%s2868_s18 + $0x1e0] sm:$0xff] }
  0x51   : > { %2483 = vmatmul.mubr.msk.f32.gmra.mrb[28].mxu1 %vm449_vm0, %v398_v18  ;;  %v430_v18 = vld [vmem:[%s2862_s15 + $0x1e8] sm:$0xff] }
  0x52   : > { %2595 = vmatmul.mubr.msk.f32.gmra.mrb[28].mxu0 %vm449_vm0, %v334_v19  ;;  %2485 = vmatprep.mubr.msk.f32.mxu1 %vm449_vm0, %v399_v20  ;;  %v366_v19 = vld [vmem:[%s2868_s18 + $0x1e8] sm:$0xff]  ;;  %v431_v20 = vld [vmem:[%s2862_s15 + $0x1f0] sm:$0xff] }
  0x53   : > { %2597 = vmatprep.mubr.msk.f32.mxu0 %vm449_vm0, %v335_v21  ;;  %v367_v21 = vld [vmem:[%s2868_s18 + $0x1f0] sm:$0xff] }
  0x55   : > { %2486 = vmatmul.mubr.msk.f32.gmra.mrb[30].mxu1 %vm449_vm0, %v400_v22  ;;  %v432_v22 = vld [vmem:[%s2862_s15 + $0x1f8] sm:$0xff] }
  0x56   : > { %2598 = vmatmul.mubr.msk.f32.gmra.mrb[30].mxu0 %vm449_vm0, %v336_v23  ;;  %2488 = vmatprep.mubr.msk.f32.mxu1 %vm449_vm0, %v401_v24  ;;  %v368_v23 = vld [vmem:[%s2868_s18 + $0x1f8] sm:$0xff] }
  0x57   : > { %2600 = vmatprep.mubr.msk.f32.mxu0 %vm449_vm0, %v337_v25 }
  0x59   : > { %2489 = vmatmul.mubr.msk.f32.gmra.mrb[32].mxu1 %vm449_vm0, %v402_v26 }
  0x5a   : > { %2601 = vmatmul.mubr.msk.f32.gmra.mrb[32].mxu0 %vm449_vm0, %v338_v27  ;;  %2491 = vmatprep.mubr.msk.f32.mxu1 %vm449_vm0, %v403_v28  ;;  %v3132_v27 = vld [vmem:[%s3474_s4] ss:$0 sm:$0xff] }
  0x5b   : > { %2603 = vmatprep.mubr.msk.f32.mxu0 %vm449_vm0, %v339_v29 }
  0x5d   : > { %2492 = vmatmul.mubr.msk.f32.gmra.mrb[34].mxu1 %vm449_vm0, %v404_v30 }
  0x5e   : > { %2604 = vmatmul.mubr.msk.f32.gmra.mrb[34].mxu0 %vm449_vm0, %v340_v31  ;;  %2494 = vmatprep.mubr.msk.f32.mxu1 %vm449_vm0, %v405_v32 }
  0x5f   : > { %2606 = vmatprep.mubr.msk.f32.mxu0 %vm449_vm0, %v341_v33 }
  0x61   : > { %2495 = vmatmul.mubr.msk.f32.gmra.mrb[36].mxu1 %vm449_vm0, %v406_v34 }
  0x62   : > { %2607 = vmatmul.mubr.msk.f32.gmra.mrb[36].mxu0 %vm449_vm0, %v342_v35  ;;  %2497 = vmatprep.mubr.msk.f32.mxu1 %vm449_vm0, %v407_v36  ;;  %v3139_v36 = vld [vmem:[%s3475_s5] ss:$0 sm:$0xff] }
  0x63   : > { %2609 = vmatprep.mubr.msk.f32.mxu0 %vm449_vm0, %v343_v37 }
  0x65   : > { %2498 = vmatmul.mubr.msk.f32.gmra.mrb[38].mxu1 %vm449_vm0, %v408_v38 }
  0x66   : > { %2610 = vmatmul.mubr.msk.f32.gmra.mrb[38].mxu0 %vm449_vm0, %v344_v39  ;;  %2500 = vmatprep.mubr.msk.f32.mxu1 %vm449_vm0, %v409_v40 }
  0x67   : > { %2612 = vmatprep.mubr.msk.f32.mxu0 %vm449_vm0, %v345_v41 }
  0x69   : > { %2501 = vmatmul.mubr.msk.f32.gmra.mrb[40].mxu1 %vm449_vm0, %v410_v42 }
  0x6a   : > { %2613 = vmatmul.mubr.msk.f32.gmra.mrb[40].mxu0 %vm449_vm0, %v346_v43  ;;  %2503 = vmatprep.mubr.msk.f32.mxu1 %vm449_vm0, %v411_v44 }
  0x6b   : > { %2615 = vmatprep.mubr.msk.f32.mxu0 %vm449_vm0, %v347_v45 }
  0x6d   : > { %2504 = vmatmul.mubr.msk.f32.gmra.mrb[42].mxu1 %vm449_vm0, %v412_v46 }
  0x6e   : > { %2616 = vmatmul.mubr.msk.f32.gmra.mrb[42].mxu0 %vm449_vm0, %v348_v47  ;;  %2506 = vmatprep.mubr.msk.f32.mxu1 %vm449_vm0, %v413_v48 }
  0x6f   : > { %2618 = vmatprep.mubr.msk.f32.mxu0 %vm449_vm0, %v349_v49 }
  0x71   : > { %2507 = vmatmul.mubr.msk.f32.gmra.mrb[44].mxu1 %vm449_vm0, %v414_v50 }
  0x72   : > { %2619 = vmatmul.mubr.msk.f32.gmra.mrb[44].mxu0 %vm449_vm0, %v350_v51  ;;  %2509 = vmatprep.mubr.msk.f32.mxu1 %vm449_vm0, %v415_v52 }
  0x73   : > { %2621 = vmatprep.mubr.msk.f32.mxu0 %vm449_vm0, %v351_v53 }
  0x75   : > { %2510 = vmatmul.mubr.msk.f32.gmra.mrb[46].mxu1 %vm449_vm0, %v416_v54 }
  0x76   : > { %2622 = vmatmul.mubr.msk.f32.gmra.mrb[46].mxu0 %vm449_vm0, %v352_v55  ;;  %2512 = vmatprep.mubr.msk.f32.mxu1 %vm449_vm0, %v417_v56 }
  0x77   : > { %2624 = vmatprep.mubr.msk.f32.mxu0 %vm449_vm0, %v353_v57 }
  0x79   : > { %2513 = vmatmul.mubr.msk.f32.gmra.mrb[48].mxu1 %vm449_vm0, %v418_v58 }
  0x7a   : > { %2625 = vmatmul.mubr.msk.f32.gmra.mrb[48].mxu0 %vm449_vm0, %v354_v59  ;;  %2515 = vmatprep.mubr.msk.f32.mxu1 %vm449_vm0, %v419_v60 }
  0x7b   : > { %2627 = vmatprep.mubr.msk.f32.mxu0 %vm449_vm0, %v355_v61 }
  0x7d   : > { %2516 = vmatmul.mubr.msk.f32.gmra.mrb[50].mxu1 %vm449_vm0, %v420_v62 }
  0x7e   : > { %2628 = vmatmul.mubr.msk.f32.gmra.mrb[50].mxu0 %vm449_vm0, %v356_v63  ;;  %2518 = vmatprep.mubr.msk.f32.mxu1 %vm449_vm0, %v421_v0 }
  0x7f   : > { %2630 = vmatprep.mubr.msk.f32.mxu0 %vm449_vm0, %v357_v1 }
  0x81   : > { %2519 = vmatmul.mubr.msk.f32.gmra.mrb[52].mxu1 %vm449_vm0, %v422_v2 }
  0x82   : > { %2631 = vmatmul.mubr.msk.f32.gmra.mrb[52].mxu0 %vm449_vm0, %v358_v3  ;;  %2521 = vmatprep.mubr.msk.f32.mxu1 %vm449_vm0, %v423_v4 }
  0x83   : > { %2633 = vmatprep.mubr.msk.f32.mxu0 %vm449_vm0, %v359_v5 }
  0x85   : > { %2522 = vmatmul.mubr.msk.f32.gmra.mrb[54].mxu1 %vm449_vm0, %v424_v6 }
  0x86   : > { %2634 = vmatmul.mubr.msk.f32.gmra.mrb[54].mxu0 %vm449_vm0, %v360_v7  ;;  %2524 = vmatprep.mubr.msk.f32.mxu1 %vm449_vm0, %v425_v8 }
  0x87   : > { %2636 = vmatprep.mubr.msk.f32.mxu0 %vm449_vm0, %v361_v9 }
  0x89   : > { %2525 = vmatmul.mubr.msk.f32.gmra.mrb[56].mxu1 %vm449_vm0, %v426_v10 }
  0x8a   : > { %2637 = vmatmul.mubr.msk.f32.gmra.mrb[56].mxu0 %vm449_vm0, %v362_v11  ;;  %2527 = vmatprep.mubr.msk.f32.mxu1 %vm449_vm0, %v427_v12 }
  0x8b   : > { %2639 = vmatprep.mubr.msk.f32.mxu0 %vm449_vm0, %v363_v13 }
  0x8d   : > { %2528 = vmatmul.mubr.msk.f32.gmra.mrb[58].mxu1 %vm449_vm0, %v428_v14 }
  0x8e   : > { %2640 = vmatmul.mubr.msk.f32.gmra.mrb[58].mxu0 %vm449_vm0, %v364_v15  ;;  %2530 = vmatprep.mubr.msk.f32.mxu1 %vm449_vm0, %v429_v16 }
  0x8f   : > { %2642 = vmatprep.mubr.msk.f32.mxu0 %vm449_vm0, %v365_v17 }
  0x91   : > { %2531 = vmatmul.mubr.msk.f32.gmra.mrb[60].mxu1 %vm449_vm0, %v430_v18 }
  0x92   : > { %2643 = vmatmul.mubr.msk.f32.gmra.mrb[60].mxu0 %vm449_vm0, %v366_v19  ;;  %2533 = vmatprep.mubr.msk.f32.mxu1 %vm449_vm0, %v431_v20 }
  0x93   : > { %2645 = vmatprep.mubr.msk.f32.mxu0 %vm449_vm0, %v367_v21 }
  0x95   : > { %2534 = vmatmul.mubr.msk.f32.gmra.mrb[62].mxu1 %vm449_vm0, %v432_v22 }
  0x96   : > { %2646 = vmatmul.mubr.msk.f32.gmra.mrb[62].mxu0 %vm449_vm0, %v368_v23 }
  0xec   : > { %v2442_v24 = vpop.f32.mrb[0].mxu1 }
  0xed   : > { %v2554_v25 = vpop.f32.mrb[0].mxu0  ;;  %v708_v26 = vpop.f32.mrb[1].mxu1 }
  0xee   : > { %v1291_v28 = vadd.f32 %v2554_v25, %v2442_v24  ;;  %v1285_v29 = vpop.f32.mrb[1].mxu0 }
  0xef   : > { %v1286_v30 = vadd.f32 %v1285_v29, %v708_v26 }
  0xf0   : > { %v2445_v31 = vpop.f32.mrb[2].mxu1  ;;  %v1612_v32 = vadd.f32 %v3132_v27, %v1291_v28 }
  0xf1   : > { %v1611_v33 = vadd.f32 %v3132_v27, %v1286_v30  ;;  %v2557_v34 = vpop.f32.mrb[2].mxu0  ;;  %v718_v35 = vpop.f32.mrb[3].mxu1 }
  0xf2   : > { %v1301_v37 = vadd.f32 %v2557_v34, %v2445_v31  ;;  %v1295_v38 = vpop.f32.mrb[3].mxu0  ;;  %v1676_v39 = vmax.f32 %v1612_v32, 0.0 }
  0xf3   : > { %v1296_v40 = vadd.f32 %v1295_v38, %v718_v35  ;;  %v1675_v41 = vmax.f32 %v1611_v33, 0.0 }
  0xf4   : > { %v1747_v42 = vmul.f32 %v3139_v36, %v1676_v39  ;;  %v2448_v43 = vpop.f32.mrb[4].mxu1  ;;  %v1614_v44 = vadd.f32 %v3132_v27, %v1301_v37 }
  0xf5   : > { %v1613_v45 = vadd.f32 %v3132_v27, %v1296_v40  ;;  %v2560_v46 = vpop.f32.mrb[4].mxu0  ;;  %v728_v47 = vpop.f32.mrb[5].mxu1  ;;  %v1746_v55 = vmul.f32 %v3139_v36, %v1675_v41 }
  0xf6   : > { %1812 = vadd.xlane.f32.xlu0 %v1747_v42  ;;  %v1311_v48 = vadd.f32 %v2560_v46, %v2448_v43  ;;  %v1305_v49 = vpop.f32.mrb[5].mxu0  ;;  %v1678_v50 = vmax.f32 %v1614_v44, 0.0 }
  0xf7   : > { %v1306_v51 = vadd.f32 %v1305_v49, %v728_v47  ;;  %v1677_v52 = vmax.f32 %v1613_v45, 0.0 }
  0xf8   : > { %v1616_v53 = vadd.f32 %v3132_v27, %v1311_v48  ;;  %v1749_v54 = vmul.f32 %v3139_v36, %v1678_v50  ;;  %v2451_v56 = vpop.f32.mrb[6].mxu1 }
  0xf9   : > { %v1615_v57 = vadd.f32 %v3132_v27, %v1306_v51  ;;  %v2563_v58 = vpop.f32.mrb[6].mxu0  ;;  %v738_v59 = vpop.f32.mrb[7].mxu1  ;;  %v1748_v2 = vmul.f32 %v3139_v36, %v1677_v52 }
  0xfa   : > { %v1680_v60 = vmax.f32 %v1616_v53, 0.0  ;;  %1816 = vadd.xlane.f32.xlu1 %v1749_v54  ;;  %1810 = vadd.xlane.f32.xlu0 %v1746_v55  ;;  %v1321_v61 = vadd.f32 %v2563_v58, %v2451_v56  ;;  %v1315_v62 = vpop.f32.mrb[7].mxu0 }
  0xfb   : > { %v1679_v63 = vmax.f32 %v1615_v57, 0.0  ;;  %v1316_v0 = vadd.f32 %v1315_v62, %v738_v59 }
  0xfc   : > { %v1618_v1 = vadd.f32 %v3132_v27, %v1321_v61  ;;  %v2454_v3 = vpop.f32.mrb[8].mxu1  ;;  %v1751_v11 = vmul.f32 %v3139_v36, %v1680_v60 }
  0xfd   : > { %v1617_v4 = vadd.f32 %v3132_v27, %v1316_v0  ;;  %v2566_v5 = vpop.f32.mrb[8].mxu0  ;;  %v748_v6 = vpop.f32.mrb[9].mxu1  ;;  %v1750_v7 = vmul.f32 %v3139_v36, %v1679_v63 }
  0xfe   : > { %v1682_v8 = vmax.f32 %v1618_v1, 0.0  ;;  %1814 = vadd.xlane.f32.xlu1 %v1748_v2  ;;  %v1331_v9 = vadd.f32 %v2566_v5, %v2454_v3  ;;  %v1325_v10 = vpop.f32.mrb[9].mxu0 }
  0xff   : > { %v1681_v12 = vmax.f32 %v1617_v4, 0.0  ;;  %v1326_v13 = vadd.f32 %v1325_v10, %v748_v6  ;;  %1818 = vadd.xlane.f32.xlu0 %v1750_v7 }
 0x100   : > { %v1620_v14 = vadd.f32 %v3132_v27, %v1331_v9  ;;  %v2457_v15 = vpop.f32.mrb[10].mxu1  ;;  %v1753_v23 = vmul.f32 %v3139_v36, %v1682_v8 }
 0x101   : > { %v1619_v16 = vadd.f32 %v3132_v27, %v1326_v13  ;;  %v2569_v17 = vpop.f32.mrb[10].mxu0  ;;  %v758_v18 = vpop.f32.mrb[11].mxu1  ;;  %v1752_v19 = vmul.f32 %v3139_v36, %v1681_v12 }
 0x102   : > { %v1684_v20 = vmax.f32 %v1620_v14, 0.0  ;;  %1820 = vadd.xlane.f32.xlu1 %v1751_v11  ;;  %v1341_v21 = vadd.f32 %v2569_v17, %v2457_v15  ;;  %v1335_v22 = vpop.f32.mrb[11].mxu0 }
 0x103   : > { %v1683_v24 = vmax.f32 %v1619_v16, 0.0  ;;  %v1336_v25 = vadd.f32 %v1335_v22, %v758_v18  ;;  %1822 = vadd.xlane.f32.xlu0 %v1752_v19 }
 0x104   : > { %v1622_v26 = vadd.f32 %v3132_v27, %v1341_v21  ;;  %v2460_v28 = vpop.f32.mrb[12].mxu1  ;;  %v1755_v37 = vmul.f32 %v3139_v36, %v1684_v20 }
 0x105   : > { %v1621_v29 = vadd.f32 %v3132_v27, %v1336_v25  ;;  %v2572_v30 = vpop.f32.mrb[12].mxu0  ;;  %v768_v31 = vpop.f32.mrb[13].mxu1  ;;  %v1754_v32 = vmul.f32 %v3139_v36, %v1683_v24 }
 0x106   : > { %v1686_v33 = vmax.f32 %v1622_v26, 0.0  ;;  %1824 = vadd.xlane.f32.xlu1 %v1753_v23  ;;  %v1351_v34 = vadd.f32 %v2572_v30, %v2460_v28  ;;  %v1345_v35 = vpop.f32.mrb[13].mxu0 }
 0x107   : > { %v1685_v38 = vmax.f32 %v1621_v29, 0.0  ;;  %v1346_v39 = vadd.f32 %v1345_v35, %v768_v31  ;;  %1826 = vadd.xlane.f32.xlu0 %v1754_v32 }
 0x108   : > { %v1624_v40 = vadd.f32 %v3132_v27, %v1351_v34  ;;  %v2463_v41 = vpop.f32.mrb[14].mxu1  ;;  %v1757_v49 = vmul.f32 %v3139_v36, %v1686_v33 }
 0x109   : > { %v1623_v42 = vadd.f32 %v3132_v27, %v1346_v39  ;;  %v2575_v43 = vpop.f32.mrb[14].mxu0  ;;  %v778_v44 = vpop.f32.mrb[15].mxu1  ;;  %v1756_v45 = vmul.f32 %v3139_v36, %v1685_v38 }
 0x10a   : > { %v1688_v46 = vmax.f32 %v1624_v40, 0.0  ;;  %1828 = vadd.xlane.f32.xlu1 %v1755_v37  ;;  %v1361_v47 = vadd.f32 %v2575_v43, %v2463_v41  ;;  %v1355_v48 = vpop.f32.mrb[15].mxu0 }
 0x10b   : > { %v1687_v50 = vmax.f32 %v1623_v42, 0.0  ;;  %v1356_v51 = vadd.f32 %v1355_v48, %v778_v44  ;;  %1830 = vadd.xlane.f32.xlu0 %v1756_v45 }
 0x10c   : > { %v1626_v52 = vadd.f32 %v3132_v27, %v1361_v47  ;;  %v2466_v53 = vpop.f32.mrb[16].mxu1  ;;  %v1759_v61 = vmul.f32 %v3139_v36, %v1688_v46 }
 0x10d   : > { %v1625_v54 = vadd.f32 %v3132_v27, %v1356_v51  ;;  %v2578_v55 = vpop.f32.mrb[16].mxu0  ;;  %v788_v56 = vpop.f32.mrb[17].mxu1  ;;  %v1758_v57 = vmul.f32 %v3139_v36, %v1687_v50 }
 0x10e   : > { %v1690_v58 = vmax.f32 %v1626_v52, 0.0  ;;  %1832 = vadd.xlane.f32.xlu1 %v1757_v49  ;;  %v1371_v59 = vadd.f32 %v2578_v55, %v2466_v53  ;;  %v1365_v60 = vpop.f32.mrb[17].mxu0 }
 0x10f   : > { %v1689_v62 = vmax.f32 %v1625_v54, 0.0  ;;  %v1366_v63 = vadd.f32 %v1365_v60, %v788_v56  ;;  %1834 = vadd.xlane.f32.xlu0 %v1758_v57 }
 0x110   : > { %v1628_v0 = vadd.f32 %v3132_v27, %v1371_v59  ;;  %v2469_v1 = vpop.f32.mrb[18].mxu1  ;;  %v1761_v9 = vmul.f32 %v3139_v36, %v1690_v58 }
 0x111   : > { %v1627_v2 = vadd.f32 %v3132_v27, %v1366_v63  ;;  %v2581_v3 = vpop.f32.mrb[18].mxu0  ;;  %v798_v4 = vpop.f32.mrb[19].mxu1  ;;  %v1760_v5 = vmul.f32 %v3139_v36, %v1689_v62 }
 0x112   : > { %v1692_v6 = vmax.f32 %v1628_v0, 0.0  ;;  %1836 = vadd.xlane.f32.xlu1 %v1759_v61  ;;  %v1381_v7 = vadd.f32 %v2581_v3, %v2469_v1  ;;  %v1375_v8 = vpop.f32.mrb[19].mxu0 }
 0x113   : > { %v1691_v10 = vmax.f32 %v1627_v2, 0.0  ;;  %v1376_v11 = vadd.f32 %v1375_v8, %v798_v4  ;;  %1838 = vadd.xlane.f32.xlu0 %v1760_v5 }
 0x114   : > { %v1630_v12 = vadd.f32 %v3132_v27, %v1381_v7  ;;  %v2472_v13 = vpop.f32.mrb[20].mxu1  ;;  %v1763_v21 = vmul.f32 %v3139_v36, %v1692_v6 }
 0x115   : > { %v1629_v14 = vadd.f32 %v3132_v27, %v1376_v11  ;;  %v2584_v15 = vpop.f32.mrb[20].mxu0  ;;  %v808_v16 = vpop.f32.mrb[21].mxu1  ;;  %v1762_v17 = vmul.f32 %v3139_v36, %v1691_v10 }
 0x116   : > { %v1694_v18 = vmax.f32 %v1630_v12, 0.0  ;;  %1840 = vadd.xlane.f32.xlu1 %v1761_v9  ;;  %v1391_v19 = vadd.f32 %v2584_v15, %v2472_v13  ;;  %v1385_v20 = vpop.f32.mrb[21].mxu0 }
 0x117   : > { %v1693_v22 = vmax.f32 %v1629_v14, 0.0  ;;  %v1386_v23 = vadd.f32 %v1385_v20, %v808_v16  ;;  %1842 = vadd.xlane.f32.xlu0 %v1762_v17 }
 0x118   : > { %v1632_v24 = vadd.f32 %v3132_v27, %v1391_v19  ;;  %v2475_v25 = vpop.f32.mrb[22].mxu1  ;;  %v1765_v34 = vmul.f32 %v3139_v36, %v1694_v18 }
 0x119   : > { %v1631_v26 = vadd.f32 %v3132_v27, %v1386_v23  ;;  %v2587_v28 = vpop.f32.mrb[22].mxu0  ;;  %v818_v29 = vpop.f32.mrb[23].mxu1  ;;  %v1764_v30 = vmul.f32 %v3139_v36, %v1693_v22 }
 0x11a   : > { %v1696_v31 = vmax.f32 %v1632_v24, 0.0  ;;  %1844 = vadd.xlane.f32.xlu1 %v1763_v21  ;;  %v1401_v32 = vadd.f32 %v2587_v28, %v2475_v25  ;;  %v1395_v33 = vpop.f32.mrb[23].mxu0 }
 0x11b   : > { %v1695_v35 = vmax.f32 %v1631_v26, 0.0  ;;  %v1396_v37 = vadd.f32 %v1395_v33, %v818_v29  ;;  %1846 = vadd.xlane.f32.xlu0 %v1764_v30 }
 0x11c   : > { %v1634_v38 = vadd.f32 %v3132_v27, %v1401_v32  ;;  %v2478_v39 = vpop.f32.mrb[24].mxu1  ;;  %v1767_v47 = vmul.f32 %v3139_v36, %v1696_v31 }
 0x11d   : > { %v1633_v40 = vadd.f32 %v3132_v27, %v1396_v37  ;;  %v2590_v41 = vpop.f32.mrb[24].mxu0  ;;  %v828_v42 = vpop.f32.mrb[25].mxu1  ;;  %v1766_v43 = vmul.f32 %v3139_v36, %v1695_v35 }
 0x11e   : > { %v1698_v44 = vmax.f32 %v1634_v38, 0.0  ;;  %1848 = vadd.xlane.f32.xlu1 %v1765_v34  ;;  %v1411_v45 = vadd.f32 %v2590_v41, %v2478_v39  ;;  %v1405_v46 = vpop.f32.mrb[25].mxu0 }
 0x11f   : > { %v1697_v48 = vmax.f32 %v1633_v40, 0.0  ;;  %v1406_v49 = vadd.f32 %v1405_v46, %v828_v42  ;;  %1850 = vadd.xlane.f32.xlu0 %v1766_v43 }
 0x120   : > { %v1636_v50 = vadd.f32 %v3132_v27, %v1411_v45  ;;  %v2481_v51 = vpop.f32.mrb[26].mxu1  ;;  %v1769_v59 = vmul.f32 %v3139_v36, %v1698_v44 }
 0x121   : > { %v1635_v52 = vadd.f32 %v3132_v27, %v1406_v49  ;;  %v2593_v53 = vpop.f32.mrb[26].mxu0  ;;  %v838_v54 = vpop.f32.mrb[27].mxu1  ;;  %v1768_v55 = vmul.f32 %v3139_v36, %v1697_v48 }
 0x122   : > { %v1700_v56 = vmax.f32 %v1636_v50, 0.0  ;;  %1852 = vadd.xlane.f32.xlu1 %v1767_v47  ;;  %v1421_v57 = vadd.f32 %v2593_v53, %v2481_v51  ;;  %v1415_v58 = vpop.f32.mrb[27].mxu0 }
 0x123   : > { %v1699_v60 = vmax.f32 %v1635_v52, 0.0  ;;  %v1416_v61 = vadd.f32 %v1415_v58, %v838_v54  ;;  %1854 = vadd.xlane.f32.xlu0 %v1768_v55 }
 0x124   : > { %v1638_v62 = vadd.f32 %v3132_v27, %v1421_v57  ;;  %v2484_v63 = vpop.f32.mrb[28].mxu1  ;;  %v1771_v7 = vmul.f32 %v3139_v36, %v1700_v56 }
 0x125   : > { %v1637_v0 = vadd.f32 %v3132_v27, %v1416_v61  ;;  %v2596_v1 = vpop.f32.mrb[28].mxu0  ;;  %v848_v2 = vpop.f32.mrb[29].mxu1  ;;  %v1770_v3 = vmul.f32 %v3139_v36, %v1699_v60 }
 0x126   : > { %v1702_v4 = vmax.f32 %v1638_v62, 0.0  ;;  %1856 = vadd.xlane.f32.xlu1 %v1769_v59  ;;  %v1431_v5 = vadd.f32 %v2596_v1, %v2484_v63  ;;  %v1425_v6 = vpop.f32.mrb[29].mxu0 }
 0x127   : > { %v1701_v8 = vmax.f32 %v1637_v0, 0.0  ;;  %v1426_v9 = vadd.f32 %v1425_v6, %v848_v2  ;;  %1858 = vadd.xlane.f32.xlu0 %v1770_v3 }
 0x128   : > { %v1640_v10 = vadd.f32 %v3132_v27, %v1431_v5  ;;  %v2487_v11 = vpop.f32.mrb[30].mxu1  ;;  %v1773_v19 = vmul.f32 %v3139_v36, %v1702_v4 }
 0x129   : > { %v1639_v12 = vadd.f32 %v3132_v27, %v1426_v9  ;;  %v2599_v13 = vpop.f32.mrb[30].mxu0  ;;  %v858_v14 = vpop.f32.mrb[31].mxu1  ;;  %v1772_v15 = vmul.f32 %v3139_v36, %v1701_v8 }
 0x12a   : > { %v1704_v16 = vmax.f32 %v1640_v10, 0.0  ;;  %1860 = vadd.xlane.f32.xlu1 %v1771_v7  ;;  %v1441_v17 = vadd.f32 %v2599_v13, %v2487_v11  ;;  %v1435_v18 = vpop.f32.mrb[31].mxu0 }
 0x12b   : > { %v1703_v20 = vmax.f32 %v1639_v12, 0.0  ;;  %v1436_v21 = vadd.f32 %v1435_v18, %v858_v14  ;;  %1862 = vadd.xlane.f32.xlu0 %v1772_v15 }
 0x12c   : > { %v1642_v22 = vadd.f32 %v3132_v27, %v1441_v17  ;;  %v2490_v23 = vpop.f32.mrb[32].mxu1  ;;  %v1775_v32 = vmul.f32 %v3139_v36, %v1704_v16 }
 0x12d   : > { %v1641_v24 = vadd.f32 %v3132_v27, %v1436_v21  ;;  %v2602_v25 = vpop.f32.mrb[32].mxu0  ;;  %v868_v26 = vpop.f32.mrb[33].mxu1  ;;  %v1774_v28 = vmul.f32 %v3139_v36, %v1703_v20 }
 0x12e   : > { %v1706_v29 = vmax.f32 %v1642_v22, 0.0  ;;  %1864 = vadd.xlane.f32.xlu1 %v1773_v19  ;;  %v1451_v30 = vadd.f32 %v2602_v25, %v2490_v23  ;;  %v1445_v31 = vpop.f32.mrb[33].mxu0 }
 0x12f   : > { %v1705_v33 = vmax.f32 %v1641_v24, 0.0  ;;  %v1446_v34 = vadd.f32 %v1445_v31, %v868_v26  ;;  %1866 = vadd.xlane.f32.xlu0 %v1774_v28 }
 0x130   : > { %v1644_v35 = vadd.f32 %v3132_v27, %v1451_v30  ;;  %v2493_v37 = vpop.f32.mrb[34].mxu1  ;;  %v1777_v45 = vmul.f32 %v3139_v36, %v1706_v29 }
 0x131   : > { %v1643_v38 = vadd.f32 %v3132_v27, %v1446_v34  ;;  %v2605_v39 = vpop.f32.mrb[34].mxu0  ;;  %v878_v40 = vpop.f32.mrb[35].mxu1  ;;  %v1776_v41 = vmul.f32 %v3139_v36, %v1705_v33 }
 0x132   : > { %v1708_v42 = vmax.f32 %v1644_v35, 0.0  ;;  %1868 = vadd.xlane.f32.xlu1 %v1775_v32  ;;  %v1461_v43 = vadd.f32 %v2605_v39, %v2493_v37  ;;  %v1455_v44 = vpop.f32.mrb[35].mxu0 }
 0x133   : > { %v1707_v46 = vmax.f32 %v1643_v38, 0.0  ;;  %v1456_v47 = vadd.f32 %v1455_v44, %v878_v40  ;;  %1870 = vadd.xlane.f32.xlu0 %v1776_v41 }
 0x134   : > { %v1646_v48 = vadd.f32 %v3132_v27, %v1461_v43  ;;  %v2496_v49 = vpop.f32.mrb[36].mxu1  ;;  %v1779_v57 = vmul.f32 %v3139_v36, %v1708_v42 }
 0x135   : > { %v1645_v50 = vadd.f32 %v3132_v27, %v1456_v47  ;;  %v2608_v51 = vpop.f32.mrb[36].mxu0  ;;  %v888_v52 = vpop.f32.mrb[37].mxu1  ;;  %v1778_v53 = vmul.f32 %v3139_v36, %v1707_v46 }
 0x136   : > { %v1710_v54 = vmax.f32 %v1646_v48, 0.0  ;;  %1872 = vadd.xlane.f32.xlu1 %v1777_v45  ;;  %v1471_v55 = vadd.f32 %v2608_v51, %v2496_v49  ;;  %v1465_v56 = vpop.f32.mrb[37].mxu0 }
 0x137   : > { %v1709_v58 = vmax.f32 %v1645_v50, 0.0  ;;  %v1466_v59 = vadd.f32 %v1465_v56, %v888_v52  ;;  %1874 = vadd.xlane.f32.xlu0 %v1778_v53 }
 0x138   : > { %v1648_v60 = vadd.f32 %v3132_v27, %v1471_v55  ;;  %v2499_v61 = vpop.f32.mrb[38].mxu1  ;;  %v1781_v5 = vmul.f32 %v3139_v36, %v1710_v54 }
 0x139   : > { %v1647_v62 = vadd.f32 %v3132_v27, %v1466_v59  ;;  %v2611_v63 = vpop.f32.mrb[38].mxu0  ;;  %v898_v0 = vpop.f32.mrb[39].mxu1  ;;  %v1780_v1 = vmul.f32 %v3139_v36, %v1709_v58 }
 0x13a   : > { %v1712_v2 = vmax.f32 %v1648_v60, 0.0  ;;  %1876 = vadd.xlane.f32.xlu1 %v1779_v57  ;;  %v1481_v3 = vadd.f32 %v2611_v63, %v2499_v61  ;;  %v1475_v4 = vpop.f32.mrb[39].mxu0 }
 0x13b   : > { %v1711_v6 = vmax.f32 %v1647_v62, 0.0  ;;  %v1476_v7 = vadd.f32 %v1475_v4, %v898_v0  ;;  %1878 = vadd.xlane.f32.xlu0 %v1780_v1 }
 0x13c   : > { %v1650_v8 = vadd.f32 %v3132_v27, %v1481_v3  ;;  %v2502_v9 = vpop.f32.mrb[40].mxu1  ;;  %v1783_v17 = vmul.f32 %v3139_v36, %v1712_v2 }
 0x13d   : > { %v1649_v10 = vadd.f32 %v3132_v27, %v1476_v7  ;;  %v2614_v11 = vpop.f32.mrb[40].mxu0  ;;  %v908_v12 = vpop.f32.mrb[41].mxu1  ;;  %v1782_v13 = vmul.f32 %v3139_v36, %v1711_v6 }
 0x13e   : > { %v1714_v14 = vmax.f32 %v1650_v8, 0.0  ;;  %1880 = vadd.xlane.f32.xlu1 %v1781_v5  ;;  %v1491_v15 = vadd.f32 %v2614_v11, %v2502_v9  ;;  %v1485_v16 = vpop.f32.mrb[41].mxu0 }
 0x13f   : > { %v1713_v18 = vmax.f32 %v1649_v10, 0.0  ;;  %v1486_v19 = vadd.f32 %v1485_v16, %v908_v12  ;;  %1882 = vadd.xlane.f32.xlu0 %v1782_v13 }
 0x140   : > { %v1652_v20 = vadd.f32 %v3132_v27, %v1491_v15  ;;  %v2505_v21 = vpop.f32.mrb[42].mxu1  ;;  %v1785_v30 = vmul.f32 %v3139_v36, %v1714_v14 }
 0x141   : > { %v1651_v22 = vadd.f32 %v3132_v27, %v1486_v19  ;;  %v2617_v23 = vpop.f32.mrb[42].mxu0  ;;  %v918_v24 = vpop.f32.mrb[43].mxu1  ;;  %v1784_v25 = vmul.f32 %v3139_v36, %v1713_v18 }
 0x142   : > { %v1716_v26 = vmax.f32 %v1652_v20, 0.0  ;;  %1884 = vadd.xlane.f32.xlu1 %v1783_v17  ;;  %v1501_v28 = vadd.f32 %v2617_v23, %v2505_v21  ;;  %v1495_v29 = vpop.f32.mrb[43].mxu0 }
 0x143   : > { %v1715_v31 = vmax.f32 %v1651_v22, 0.0  ;;  %v1496_v32 = vadd.f32 %v1495_v29, %v918_v24  ;;  %1886 = vadd.xlane.f32.xlu0 %v1784_v25 }
 0x144   : > { %v1654_v33 = vadd.f32 %v3132_v27, %v1501_v28  ;;  %v2508_v34 = vpop.f32.mrb[44].mxu1  ;;  %v1787_v43 = vmul.f32 %v3139_v36, %v1716_v26 }
 0x145   : > { %v1653_v35 = vadd.f32 %v3132_v27, %v1496_v32  ;;  %v2620_v37 = vpop.f32.mrb[44].mxu0  ;;  %v928_v38 = vpop.f32.mrb[45].mxu1  ;;  %v1786_v39 = vmul.f32 %v3139_v36, %v1715_v31 }
 0x146   : > { %v1718_v40 = vmax.f32 %v1654_v33, 0.0  ;;  %1888 = vadd.xlane.f32.xlu1 %v1785_v30  ;;  %v1511_v41 = vadd.f32 %v2620_v37, %v2508_v34  ;;  %v1505_v42 = vpop.f32.mrb[45].mxu0 }
 0x147   : > { %v1717_v44 = vmax.f32 %v1653_v35, 0.0  ;;  %v1506_v45 = vadd.f32 %v1505_v42, %v928_v38  ;;  %1890 = vadd.xlane.f32.xlu0 %v1786_v39 }
 0x148   : > { %v1656_v46 = vadd.f32 %v3132_v27, %v1511_v41  ;;  %v2511_v47 = vpop.f32.mrb[46].mxu1  ;;  %v1789_v55 = vmul.f32 %v3139_v36, %v1718_v40 }
 0x149   : > { %v1655_v48 = vadd.f32 %v3132_v27, %v1506_v45  ;;  %v2623_v49 = vpop.f32.mrb[46].mxu0  ;;  %v938_v50 = vpop.f32.mrb[47].mxu1  ;;  %v1788_v51 = vmul.f32 %v3139_v36, %v1717_v44 }
 0x14a   : > { %v1720_v52 = vmax.f32 %v1656_v46, 0.0  ;;  %1892 = vadd.xlane.f32.xlu1 %v1787_v43  ;;  %v1521_v53 = vadd.f32 %v2623_v49, %v2511_v47  ;;  %v1515_v54 = vpop.f32.mrb[47].mxu0 }
 0x14b   : > { %v1719_v56 = vmax.f32 %v1655_v48, 0.0  ;;  %v1516_v57 = vadd.f32 %v1515_v54, %v938_v50  ;;  %1894 = vadd.xlane.f32.xlu0 %v1788_v51 }
 0x14c   : > { %v1658_v58 = vadd.f32 %v3132_v27, %v1521_v53  ;;  %v2514_v59 = vpop.f32.mrb[48].mxu1  ;;  %v1791_v3 = vmul.f32 %v3139_v36, %v1720_v52 }
 0x14d   : > { %v1657_v60 = vadd.f32 %v3132_v27, %v1516_v57  ;;  %v2626_v61 = vpop.f32.mrb[48].mxu0  ;;  %v948_v62 = vpop.f32.mrb[49].mxu1  ;;  %v1790_v63 = vmul.f32 %v3139_v36, %v1719_v56 }
 0x14e   : > { %v1722_v0 = vmax.f32 %v1658_v58, 0.0  ;;  %1896 = vadd.xlane.f32.xlu1 %v1789_v55  ;;  %v1531_v1 = vadd.f32 %v2626_v61, %v2514_v59  ;;  %v1525_v2 = vpop.f32.mrb[49].mxu0 }
 0x14f   : > { %v1721_v4 = vmax.f32 %v1657_v60, 0.0  ;;  %v1526_v5 = vadd.f32 %v1525_v2, %v948_v62  ;;  %1898 = vadd.xlane.f32.xlu0 %v1790_v63 }
 0x150   : > { %v1660_v6 = vadd.f32 %v3132_v27, %v1531_v1  ;;  %v2517_v7 = vpop.f32.mrb[50].mxu1  ;;  %v1793_v15 = vmul.f32 %v3139_v36, %v1722_v0 }
 0x151   : > { %v1659_v8 = vadd.f32 %v3132_v27, %v1526_v5  ;;  %v2629_v9 = vpop.f32.mrb[50].mxu0  ;;  %v958_v10 = vpop.f32.mrb[51].mxu1  ;;  %v1792_v11 = vmul.f32 %v3139_v36, %v1721_v4 }
 0x152   : > { %v1724_v12 = vmax.f32 %v1660_v6, 0.0  ;;  %1900 = vadd.xlane.f32.xlu1 %v1791_v3  ;;  %v1541_v13 = vadd.f32 %v2629_v9, %v2517_v7  ;;  %v1535_v14 = vpop.f32.mrb[51].mxu0 }
 0x153   : > { %v1723_v16 = vmax.f32 %v1659_v8, 0.0  ;;  %v1536_v17 = vadd.f32 %v1535_v14, %v958_v10  ;;  %1902 = vadd.xlane.f32.xlu0 %v1792_v11 }
 0x154   : > { %v1662_v18 = vadd.f32 %v3132_v27, %v1541_v13  ;;  %v2520_v19 = vpop.f32.mrb[52].mxu1  ;;  %v1795_v28 = vmul.f32 %v3139_v36, %v1724_v12 }
 0x155   : > { %v1661_v20 = vadd.f32 %v3132_v27, %v1536_v17  ;;  %v2632_v21 = vpop.f32.mrb[52].mxu0  ;;  %v968_v22 = vpop.f32.mrb[53].mxu1  ;;  %v1794_v23 = vmul.f32 %v3139_v36, %v1723_v16 }
 0x156   : > { %v1726_v24 = vmax.f32 %v1662_v18, 0.0  ;;  %1904 = vadd.xlane.f32.xlu1 %v1793_v15  ;;  %v1551_v25 = vadd.f32 %v2632_v21, %v2520_v19  ;;  %v1545_v26 = vpop.f32.mrb[53].mxu0 }
 0x157   : > { %v1725_v29 = vmax.f32 %v1661_v20, 0.0  ;;  %v1546_v30 = vadd.f32 %v1545_v26, %v968_v22  ;;  %1906 = vadd.xlane.f32.xlu0 %v1794_v23 }
 0x158   : > { %v1664_v31 = vadd.f32 %v3132_v27, %v1551_v25  ;;  %v2523_v32 = vpop.f32.mrb[54].mxu1  ;;  %v1797_v41 = vmul.f32 %v3139_v36, %v1726_v24 }
 0x159   : > { %v1663_v33 = vadd.f32 %v3132_v27, %v1546_v30  ;;  %v2635_v34 = vpop.f32.mrb[54].mxu0  ;;  %v978_v35 = vpop.f32.mrb[55].mxu1  ;;  %v1796_v37 = vmul.f32 %v3139_v36, %v1725_v29 }
 0x15a   : > { %v1728_v38 = vmax.f32 %v1664_v31, 0.0  ;;  %1908 = vadd.xlane.f32.xlu1 %v1795_v28  ;;  %v1561_v39 = vadd.f32 %v2635_v34, %v2523_v32  ;;  %v1555_v40 = vpop.f32.mrb[55].mxu0 }
 0x15b   : > { %v1727_v42 = vmax.f32 %v1663_v33, 0.0  ;;  %v1556_v43 = vadd.f32 %v1555_v40, %v978_v35  ;;  %1910 = vadd.xlane.f32.xlu0 %v1796_v37 }
 0x15c   : > { %v1666_v44 = vadd.f32 %v3132_v27, %v1561_v39  ;;  %v2526_v45 = vpop.f32.mrb[56].mxu1  ;;  %v1799_v53 = vmul.f32 %v3139_v36, %v1728_v38  ;;  %v3267_v38 = vstv %s1938_s25 }
 0x15d   : > { %v1665_v46 = vadd.f32 %v3132_v27, %v1556_v43  ;;  %v2638_v47 = vpop.f32.mrb[56].mxu0  ;;  %v988_v48 = vpop.f32.mrb[57].mxu1  ;;  %v1798_v49 = vmul.f32 %v3139_v36, %v1727_v42 }
 0x15e   : > { %v1730_v50 = vmax.f32 %v1666_v44, 0.0  ;;  %1912 = vadd.xlane.f32.xlu1 %v1797_v41  ;;  %v1571_v51 = vadd.f32 %v2638_v47, %v2526_v45  ;;  %v1565_v52 = vpop.f32.mrb[57].mxu0 }
 0x15f   : > { %v1729_v54 = vmax.f32 %v1665_v46, 0.0  ;;  %v1566_v55 = vadd.f32 %v1565_v52, %v988_v48  ;;  %1914 = vadd.xlane.f32.xlu0 %v1798_v49 }
 0x160   : > { %v1668_v56 = vadd.f32 %v3132_v27, %v1571_v51  ;;  %v2529_v57 = vpop.f32.mrb[58].mxu1  ;;  %v1801_v1 = vmul.f32 %v3139_v36, %v1730_v50 }
 0x161   : > { %v1667_v58 = vadd.f32 %v3132_v27, %v1566_v55  ;;  %v2641_v59 = vpop.f32.mrb[58].mxu0  ;;  %v998_v60 = vpop.f32.mrb[59].mxu1  ;;  %v1800_v61 = vmul.f32 %v3139_v36, %v1729_v54 }
 0x162   : > { %v1732_v62 = vmax.f32 %v1668_v56, 0.0  ;;  %1916 = vadd.xlane.f32.xlu1 %v1799_v53  ;;  %v1581_v63 = vadd.f32 %v2641_v59, %v2529_v57  ;;  %v1575_v0 = vpop.f32.mrb[59].mxu0 }
 0x163   : > { %v1731_v2 = vmax.f32 %v1667_v58, 0.0  ;;  %v1576_v3 = vadd.f32 %v1575_v0, %v998_v60  ;;  %1918 = vadd.xlane.f32.xlu0 %v1800_v61 }
 0x164   : > { %v1670_v4 = vadd.f32 %v3132_v27, %v1581_v63  ;;  %v2532_v5 = vpop.f32.mrb[60].mxu1  ;;  %v1803_v13 = vmul.f32 %v3139_v36, %v1732_v62 }
 0x165   : > { %v1669_v6 = vadd.f32 %v3132_v27, %v1576_v3  ;;  %v2644_v7 = vpop.f32.mrb[60].mxu0  ;;  %v1008_v8 = vpop.f32.mrb[61].mxu1  ;;  %v1802_v9 = vmul.f32 %v3139_v36, %v1731_v2 }
 0x166   : > { %v1734_v10 = vmax.f32 %v1670_v4, 0.0  ;;  %1920 = vadd.xlane.f32.xlu1 %v1801_v1  ;;  %v1591_v11 = vadd.f32 %v2644_v7, %v2532_v5  ;;  %v1585_v12 = vpop.f32.mrb[61].mxu0 }
 0x167   : > { %v1733_v14 = vmax.f32 %v1669_v6, 0.0  ;;  %v1586_v15 = vadd.f32 %v1585_v12, %v1008_v8  ;;  %1922 = vadd.xlane.f32.xlu0 %v1802_v9 }
 0x168   : > { %v1672_v16 = vadd.f32 %v3132_v27, %v1591_v11  ;;  %v2535_v17 = vpop.f32.mrb[62].mxu1  ;;  %v1805_v25 = vmul.f32 %v3139_v36, %v1734_v10 }
 0x169   : > { %v1671_v18 = vadd.f32 %v3132_v27, %v1586_v15  ;;  %v2647_v19 = vpop.f32.mrb[62].mxu0  ;;  %v1018_v20 = vpop.f32.mrb[63].mxu1  ;;  %v1804_v21 = vmul.f32 %v3139_v36, %v1733_v14 }
 0x16a   : > { %v1736_v22 = vmax.f32 %v1672_v16, 0.0  ;;  %1924 = vadd.xlane.f32.xlu1 %v1803_v13  ;;  %v1601_v23 = vadd.f32 %v2647_v19, %v2535_v17  ;;  %v1595_v24 = vpop.f32.mrb[63].mxu0 }
 0x16b   : > { %v1735_v26 = vmax.f32 %v1671_v18, 0.0  ;;  %v1596_v28 = vadd.f32 %v1595_v24, %v1018_v20  ;;  %1926 = vadd.xlane.f32.xlu0 %v1804_v21 }
 0x16c   : > { %v1674_v29 = vadd.f32 %v3132_v27, %v1601_v23  ;;  %v1807_v33 = vmul.f32 %v3139_v36, %v1736_v22 }
 0x16d   : > { %v1673_v30 = vadd.f32 %v3132_v27, %v1596_v28  ;;  %v1806_v31 = vmul.f32 %v3139_v36, %v1735_v26 }
 0x16e   : > { %v1738_v32 = vmax.f32 %v1674_v29, 0.0  ;;  %1928 = vadd.xlane.f32.xlu1 %v1805_v25 }
 0x16f   : > { %v1737_v34 = vmax.f32 %v1673_v30, 0.0  ;;  %1930 = vadd.xlane.f32.xlu0 %v1806_v31 }
 0x170   : > { %v1809_v37 = vmul.f32 %v3139_v36, %v1738_v32 }
 0x171   : > { %v1808_v35 = vmul.f32 %v3139_v36, %v1737_v34 }
 0x172   : > { %1932 = vadd.xlane.f32.xlu1 %v1807_v33 }
 0x173   : > { %1934 = vadd.xlane.f32.xlu0 %v1808_v35 }
 0x176   : > { %1936 = vadd.xlane.f32.xlu1 %v1809_v37 }
 0x183   : > { %v1813_v27 = vpop.xlane.xlu0 %1812 }
 0x184   : > { %v1941_v39 = vadd.f32 %v3267_v38, %v1813_v27 }
 0x186   : > { %2006 = vst.msk [vmem:[%s3273_s29 + $0x8] sm:$0xff] %vm2004_vm1, %v1941_v39 }
 0x187   : > { %v1817_v36 = vpop.xlane.xlu1 %1816  ;;  %v1811_v40 = vpop.xlane.xlu0 %1810 }
 0x188   : > { %v1943_v41 = vadd.f32 %v3267_v38, %v1817_v36  ;;  %v1940_v42 = vadd.f32 %v3267_v38, %v1811_v40 }
 0x18a   : > { %2008 = vst.msk [vmem:[%s3273_s29 + $0x18] sm:$0xff] %vm2004_vm1, %v1943_v41  ;;  %2005 = vst.msk [vmem:[%s3273_s29] sm:$0xff] %vm2004_vm1, %v1940_v42 }
 0x18b   : > { %v1815_v43 = vpop.xlane.xlu1 %1814 }
 0x18c   : > { %v1942_v44 = vadd.f32 %v3267_v38, %v1815_v43  ;;  %v1819_v45 = vpop.xlane.xlu0 %1818 }
 0x18d   : > { %v1944_v46 = vadd.f32 %v3267_v38, %v1819_v45 }
 0x18e   : > { %2007 = vst.msk [vmem:[%s3273_s29 + $0x10] sm:$0xff] %vm2004_vm1, %v1942_v44 }
 0x18f   : > { %2009 = vst.msk [vmem:[%s3273_s29 + $0x20] sm:$0xff] %vm2004_vm1, %v1944_v46  ;;  %v1821_v47 = vpop.xlane.xlu1 %1820 }
 0x190   : > { %v1945_v48 = vadd.f32 %v3267_v38, %v1821_v47  ;;  %v1823_v49 = vpop.xlane.xlu0 %1822 }
 0x191   : > { %v1946_v50 = vadd.f32 %v3267_v38, %v1823_v49 }
 0x192   : > { %2010 = vst.msk [vmem:[%s3273_s29 + $0x28] sm:$0xff] %vm2004_vm1, %v1945_v48 }
 0x193   : > { %2011 = vst.msk [vmem:[%s3273_s29 + $0x30] sm:$0xff] %vm2004_vm1, %v1946_v50  ;;  %v1825_v51 = vpop.xlane.xlu1 %1824 }
 0x194   : > { %v1947_v52 = vadd.f32 %v3267_v38, %v1825_v51  ;;  %v1827_v53 = vpop.xlane.xlu0 %1826 }
 0x195   : > { %v1948_v54 = vadd.f32 %v3267_v38, %v1827_v53 }
 0x196   : > { %2012 = vst.msk [vmem:[%s3273_s29 + $0x38] sm:$0xff] %vm2004_vm1, %v1947_v52 }
 0x197   : > { %2013 = vst.msk [vmem:[%s3273_s29 + $0x40] sm:$0xff] %vm2004_vm1, %v1948_v54  ;;  %v1829_v55 = vpop.xlane.xlu1 %1828 }
 0x198   : > { %v1949_v56 = vadd.f32 %v3267_v38, %v1829_v55  ;;  %v1831_v57 = vpop.xlane.xlu0 %1830 }
 0x199   : > { %v1950_v58 = vadd.f32 %v3267_v38, %v1831_v57 }
 0x19a   : > { %2014 = vst.msk [vmem:[%s3273_s29 + $0x48] sm:$0xff] %vm2004_vm1, %v1949_v56 }
 0x19b   : > { %2015 = vst.msk [vmem:[%s3273_s29 + $0x50] sm:$0xff] %vm2004_vm1, %v1950_v58  ;;  %v1833_v59 = vpop.xlane.xlu1 %1832 }
 0x19c   : > { %v1951_v60 = vadd.f32 %v3267_v38, %v1833_v59  ;;  %v1835_v61 = vpop.xlane.xlu0 %1834 }
 0x19d   : > { %v1952_v62 = vadd.f32 %v3267_v38, %v1835_v61 }
 0x19e   : > { %2016 = vst.msk [vmem:[%s3273_s29 + $0x58] sm:$0xff] %vm2004_vm1, %v1951_v60 }
 0x19f   : > { %2017 = vst.msk [vmem:[%s3273_s29 + $0x60] sm:$0xff] %vm2004_vm1, %v1952_v62  ;;  %v1837_v63 = vpop.xlane.xlu1 %1836 }
 0x1a0   : > { %v1953_v0 = vadd.f32 %v3267_v38, %v1837_v63  ;;  %v1839_v1 = vpop.xlane.xlu0 %1838 }
 0x1a1   : > { %v1954_v2 = vadd.f32 %v3267_v38, %v1839_v1 }
 0x1a2   : > { %2018 = vst.msk [vmem:[%s3273_s29 + $0x68] sm:$0xff] %vm2004_vm1, %v1953_v0 }
 0x1a3   : > { %2019 = vst.msk [vmem:[%s3273_s29 + $0x70] sm:$0xff] %vm2004_vm1, %v1954_v2  ;;  %v1841_v3 = vpop.xlane.xlu1 %1840 }
 0x1a4   : > { %v1955_v4 = vadd.f32 %v3267_v38, %v1841_v3  ;;  %v1843_v5 = vpop.xlane.xlu0 %1842 }
 0x1a5   : > { %v1956_v6 = vadd.f32 %v3267_v38, %v1843_v5 }
 0x1a6   : > { %2020 = vst.msk [vmem:[%s3273_s29 + $0x78] sm:$0xff] %vm2004_vm1, %v1955_v4 }
 0x1a7   : > { %2021 = vst.msk [vmem:[%s3273_s29 + $0x80] sm:$0xff] %vm2004_vm1, %v1956_v6  ;;  %v1845_v7 = vpop.xlane.xlu1 %1844 }
 0x1a8   : > { %v1957_v8 = vadd.f32 %v3267_v38, %v1845_v7  ;;  %v1847_v9 = vpop.xlane.xlu0 %1846 }
 0x1a9   : > { %v1958_v10 = vadd.f32 %v3267_v38, %v1847_v9 }
 0x1aa   : > { %2022 = vst.msk [vmem:[%s3273_s29 + $0x88] sm:$0xff] %vm2004_vm1, %v1957_v8 }
 0x1ab   : > { %2023 = vst.msk [vmem:[%s3273_s29 + $0x90] sm:$0xff] %vm2004_vm1, %v1958_v10  ;;  %v1849_v11 = vpop.xlane.xlu1 %1848 }
 0x1ac   : > { %v1959_v12 = vadd.f32 %v3267_v38, %v1849_v11  ;;  %v1851_v13 = vpop.xlane.xlu0 %1850 }
 0x1ad   : > { %v1960_v14 = vadd.f32 %v3267_v38, %v1851_v13 }
 0x1ae   : > { %2024 = vst.msk [vmem:[%s3273_s29 + $0x98] sm:$0xff] %vm2004_vm1, %v1959_v12 }
 0x1af   : > { %2025 = vst.msk [vmem:[%s3273_s29 + $0xa0] sm:$0xff] %vm2004_vm1, %v1960_v14  ;;  %v1853_v15 = vpop.xlane.xlu1 %1852 }
 0x1b0   : > { %v1961_v16 = vadd.f32 %v3267_v38, %v1853_v15  ;;  %v1855_v17 = vpop.xlane.xlu0 %1854 }
 0x1b1   : > { %v1962_v18 = vadd.f32 %v3267_v38, %v1855_v17 }
 0x1b2   : > { %2026 = vst.msk [vmem:[%s3273_s29 + $0xa8] sm:$0xff] %vm2004_vm1, %v1961_v16 }
 0x1b3   : > { %2027 = vst.msk [vmem:[%s3273_s29 + $0xb0] sm:$0xff] %vm2004_vm1, %v1962_v18  ;;  %v1857_v19 = vpop.xlane.xlu1 %1856 }
 0x1b4   : > { %v1963_v20 = vadd.f32 %v3267_v38, %v1857_v19  ;;  %v1859_v21 = vpop.xlane.xlu0 %1858 }
 0x1b5   : > { %v1964_v22 = vadd.f32 %v3267_v38, %v1859_v21 }
 0x1b6   : > { %2028 = vst.msk [vmem:[%s3273_s29 + $0xb8] sm:$0xff] %vm2004_vm1, %v1963_v20 }
 0x1b7   : > { %2029 = vst.msk [vmem:[%s3273_s29 + $0xc0] sm:$0xff] %vm2004_vm1, %v1964_v22  ;;  %v1861_v23 = vpop.xlane.xlu1 %1860 }
 0x1b8   : > { %v1965_v24 = vadd.f32 %v3267_v38, %v1861_v23  ;;  %v1863_v25 = vpop.xlane.xlu0 %1862 }
 0x1b9   : > { %v1966_v26 = vadd.f32 %v3267_v38, %v1863_v25 }
 0x1ba   : > { %2030 = vst.msk [vmem:[%s3273_s29 + $0xc8] sm:$0xff] %vm2004_vm1, %v1965_v24 }
 0x1bb   : > { %2031 = vst.msk [vmem:[%s3273_s29 + $0xd0] sm:$0xff] %vm2004_vm1, %v1966_v26  ;;  %v1865_v28 = vpop.xlane.xlu1 %1864 }
 0x1bc   : > { %v1967_v29 = vadd.f32 %v3267_v38, %v1865_v28  ;;  %v1867_v30 = vpop.xlane.xlu0 %1866 }
 0x1bd   : > { %v1968_v31 = vadd.f32 %v3267_v38, %v1867_v30 }
 0x1be   : > { %2032 = vst.msk [vmem:[%s3273_s29 + $0xd8] sm:$0xff] %vm2004_vm1, %v1967_v29 }
 0x1bf   : > { %2033 = vst.msk [vmem:[%s3273_s29 + $0xe0] sm:$0xff] %vm2004_vm1, %v1968_v31  ;;  %v1869_v32 = vpop.xlane.xlu1 %1868 }
 0x1c0   : > { %v1969_v33 = vadd.f32 %v3267_v38, %v1869_v32  ;;  %v1871_v34 = vpop.xlane.xlu0 %1870 }
 0x1c1   : > { %v1970_v35 = vadd.f32 %v3267_v38, %v1871_v34 }
 0x1c2   : > { %2034 = vst.msk [vmem:[%s3273_s29 + $0xe8] sm:$0xff] %vm2004_vm1, %v1969_v33 }
 0x1c3   : > { %2035 = vst.msk [vmem:[%s3273_s29 + $0xf0] sm:$0xff] %vm2004_vm1, %v1970_v35  ;;  %v1873_v37 = vpop.xlane.xlu1 %1872 }
 0x1c4   : > { %v1971_v27 = vadd.f32 %v3267_v38, %v1873_v37  ;;  %v1875_v39 = vpop.xlane.xlu0 %1874 }
 0x1c5   : > { %v1972_v36 = vadd.f32 %v3267_v38, %v1875_v39 }
 0x1c6   : > { %2036 = vst.msk [vmem:[%s3273_s29 + $0xf8] sm:$0xff] %vm2004_vm1, %v1971_v27 }
 0x1c7   : > { %2037 = vst.msk [vmem:[%s3273_s29 + $0x100] sm:$0xff] %vm2004_vm1, %v1972_v36  ;;  %v1877_v40 = vpop.xlane.xlu1 %1876 }
 0x1c8   : > { %v1973_v41 = vadd.f32 %v3267_v38, %v1877_v40  ;;  %v1879_v42 = vpop.xlane.xlu0 %1878 }
 0x1c9   : > { %v1974_v43 = vadd.f32 %v3267_v38, %v1879_v42 }
 0x1ca   : > { %2038 = vst.msk [vmem:[%s3273_s29 + $0x108] sm:$0xff] %vm2004_vm1, %v1973_v41 }
 0x1cb   : > { %2039 = vst.msk [vmem:[%s3273_s29 + $0x110] sm:$0xff] %vm2004_vm1, %v1974_v43  ;;  %v1881_v44 = vpop.xlane.xlu1 %1880 }
 0x1cc   : > { %v1975_v45 = vadd.f32 %v3267_v38, %v1881_v44  ;;  %v1883_v46 = vpop.xlane.xlu0 %1882 }
 0x1cd   : > { %v1976_v47 = vadd.f32 %v3267_v38, %v1883_v46 }
 0x1ce   : > { %2040 = vst.msk [vmem:[%s3273_s29 + $0x118] sm:$0xff] %vm2004_vm1, %v1975_v45 }
 0x1cf   : > { %2041 = vst.msk [vmem:[%s3273_s29 + $0x120] sm:$0xff] %vm2004_vm1, %v1976_v47  ;;  %v1885_v48 = vpop.xlane.xlu1 %1884 }
 0x1d0   : > { %v1977_v49 = vadd.f32 %v3267_v38, %v1885_v48  ;;  %v1887_v50 = vpop.xlane.xlu0 %1886 }
 0x1d1   : > { %v1978_v51 = vadd.f32 %v3267_v38, %v1887_v50 }
 0x1d2   : > { %2042 = vst.msk [vmem:[%s3273_s29 + $0x128] sm:$0xff] %vm2004_vm1, %v1977_v49 }
 0x1d3   : > { %2043 = vst.msk [vmem:[%s3273_s29 + $0x130] sm:$0xff] %vm2004_vm1, %v1978_v51  ;;  %v1889_v52 = vpop.xlane.xlu1 %1888 }
 0x1d4   : > { %v1979_v53 = vadd.f32 %v3267_v38, %v1889_v52  ;;  %v1891_v54 = vpop.xlane.xlu0 %1890 }
 0x1d5   : > { %v1980_v55 = vadd.f32 %v3267_v38, %v1891_v54 }
 0x1d6   : > { %2044 = vst.msk [vmem:[%s3273_s29 + $0x138] sm:$0xff] %vm2004_vm1, %v1979_v53 }
 0x1d7   : > { %2045 = vst.msk [vmem:[%s3273_s29 + $0x140] sm:$0xff] %vm2004_vm1, %v1980_v55  ;;  %v1893_v56 = vpop.xlane.xlu1 %1892 }
 0x1d8   : > { %v1981_v57 = vadd.f32 %v3267_v38, %v1893_v56  ;;  %v1895_v58 = vpop.xlane.xlu0 %1894 }
 0x1d9   : > { %v1982_v59 = vadd.f32 %v3267_v38, %v1895_v58 }
 0x1da   : > { %2046 = vst.msk [vmem:[%s3273_s29 + $0x148] sm:$0xff] %vm2004_vm1, %v1981_v57 }
 0x1db   : > { %2047 = vst.msk [vmem:[%s3273_s29 + $0x150] sm:$0xff] %vm2004_vm1, %v1982_v59  ;;  %v1897_v60 = vpop.xlane.xlu1 %1896 }
 0x1dc   : > { %v1983_v61 = vadd.f32 %v3267_v38, %v1897_v60  ;;  %v1899_v62 = vpop.xlane.xlu0 %1898 }
 0x1dd   : > { %v1984_v63 = vadd.f32 %v3267_v38, %v1899_v62 }
 0x1de   : > { %2048 = vst.msk [vmem:[%s3273_s29 + $0x158] sm:$0xff] %vm2004_vm1, %v1983_v61 }
 0x1df   : > { %2049 = vst.msk [vmem:[%s3273_s29 + $0x160] sm:$0xff] %vm2004_vm1, %v1984_v63  ;;  %v1901_v0 = vpop.xlane.xlu1 %1900 }
 0x1e0   : > { %v1985_v1 = vadd.f32 %v3267_v38, %v1901_v0  ;;  %v1903_v2 = vpop.xlane.xlu0 %1902 }
 0x1e1   : > { %v1986_v3 = vadd.f32 %v3267_v38, %v1903_v2 }
 0x1e2   : > { %2050 = vst.msk [vmem:[%s3273_s29 + $0x168] sm:$0xff] %vm2004_vm1, %v1985_v1 }
 0x1e3   : > { %2051 = vst.msk [vmem:[%s3273_s29 + $0x170] sm:$0xff] %vm2004_vm1, %v1986_v3  ;;  %v1905_v4 = vpop.xlane.xlu1 %1904 }
 0x1e4   : > { %v1987_v5 = vadd.f32 %v3267_v38, %v1905_v4  ;;  %v1907_v6 = vpop.xlane.xlu0 %1906 }
 0x1e5   : > { %v1988_v7 = vadd.f32 %v3267_v38, %v1907_v6 }
 0x1e6   : > { %2052 = vst.msk [vmem:[%s3273_s29 + $0x178] sm:$0xff] %vm2004_vm1, %v1987_v5 }
 0x1e7   : > { %2053 = vst.msk [vmem:[%s3273_s29 + $0x180] sm:$0xff] %vm2004_vm1, %v1988_v7  ;;  %v1909_v8 = vpop.xlane.xlu1 %1908 }
 0x1e8   : > { %v1989_v9 = vadd.f32 %v3267_v38, %v1909_v8  ;;  %v1911_v10 = vpop.xlane.xlu0 %1910 }
 0x1e9   : > { %v1990_v11 = vadd.f32 %v3267_v38, %v1911_v10 }
 0x1ea   : > { %2054 = vst.msk [vmem:[%s3273_s29 + $0x188] sm:$0xff] %vm2004_vm1, %v1989_v9 }
 0x1eb   : > { %2055 = vst.msk [vmem:[%s3273_s29 + $0x190] sm:$0xff] %vm2004_vm1, %v1990_v11  ;;  %v1913_v12 = vpop.xlane.xlu1 %1912 }
 0x1ec   : > { %v1991_v13 = vadd.f32 %v3267_v38, %v1913_v12  ;;  %v1915_v14 = vpop.xlane.xlu0 %1914 }
 0x1ed   : > { %v1992_v15 = vadd.f32 %v3267_v38, %v1915_v14 }
 0x1ee   : > { %2056 = vst.msk [vmem:[%s3273_s29 + $0x198] sm:$0xff] %vm2004_vm1, %v1991_v13 }
 0x1ef   : > { %2057 = vst.msk [vmem:[%s3273_s29 + $0x1a0] sm:$0xff] %vm2004_vm1, %v1992_v15  ;;  %v1917_v16 = vpop.xlane.xlu1 %1916 }
 0x1f0   : > { %v1993_v17 = vadd.f32 %v3267_v38, %v1917_v16  ;;  %v1919_v18 = vpop.xlane.xlu0 %1918 }
 0x1f1   : > { %v1994_v19 = vadd.f32 %v3267_v38, %v1919_v18 }
 0x1f2   : > { %2058 = vst.msk [vmem:[%s3273_s29 + $0x1a8] sm:$0xff] %vm2004_vm1, %v1993_v17 }
 0x1f3   : > { %2059 = vst.msk [vmem:[%s3273_s29 + $0x1b0] sm:$0xff] %vm2004_vm1, %v1994_v19  ;;  %v1921_v20 = vpop.xlane.xlu1 %1920 }
 0x1f4   : > { %v1995_v21 = vadd.f32 %v3267_v38, %v1921_v20  ;;  %v1923_v22 = vpop.xlane.xlu0 %1922 }
 0x1f5   : > { %v1996_v23 = vadd.f32 %v3267_v38, %v1923_v22 }
 0x1f6   : > { %2060 = vst.msk [vmem:[%s3273_s29 + $0x1b8] sm:$0xff] %vm2004_vm1, %v1995_v21 }
 0x1f7   : > { %2061 = vst.msk [vmem:[%s3273_s29 + $0x1c0] sm:$0xff] %vm2004_vm1, %v1996_v23  ;;  %v1925_v24 = vpop.xlane.xlu1 %1924 }
 0x1f8   : > { %v1997_v25 = vadd.f32 %v3267_v38, %v1925_v24  ;;  %v1927_v26 = vpop.xlane.xlu0 %1926 }
 0x1f9   : > { %v1998_v28 = vadd.f32 %v3267_v38, %v1927_v26 }
 0x1fa   : > { %2062 = vst.msk [vmem:[%s3273_s29 + $0x1c8] sm:$0xff] %vm2004_vm1, %v1997_v25 }
 0x1fb   : > { %2063 = vst.msk [vmem:[%s3273_s29 + $0x1d0] sm:$0xff] %vm2004_vm1, %v1998_v28  ;;  %v1929_v29 = vpop.xlane.xlu1 %1928 }
 0x1fc   : > { %v1999_v30 = vadd.f32 %v3267_v38, %v1929_v29  ;;  %v1931_v31 = vpop.xlane.xlu0 %1930 }
 0x1fd   : > { %v2000_v32 = vadd.f32 %v3267_v38, %v1931_v31 }
 0x1fe   : > { %2064 = vst.msk [vmem:[%s3273_s29 + $0x1d8] sm:$0xff] %vm2004_vm1, %v1999_v30 }
 0x1ff   : > { %2065 = vst.msk [vmem:[%s3273_s29 + $0x1e0] sm:$0xff] %vm2004_vm1, %v2000_v32  ;;  %v1933_v33 = vpop.xlane.xlu1 %1932 }
 0x200   : > { %v2001_v34 = vadd.f32 %v3267_v38, %v1933_v33  ;;  %v1935_v35 = vpop.xlane.xlu0 %1934 }
 0x201   : > { %v2002_v37 = vadd.f32 %v3267_v38, %v1935_v35 }
 0x202   : > { %2066 = vst.msk [vmem:[%s3273_s29 + $0x1e8] sm:$0xff] %vm2004_vm1, %v2001_v34 }
 0x203   : > { %2067 = vst.msk [vmem:[%s3273_s29 + $0x1f0] sm:$0xff] %vm2004_vm1, %v2002_v37  ;;  %v1937_v27 = vpop.xlane.xlu1 %1936 }
 0x204   : > { %v2003_v39 = vadd.f32 %v3267_v38, %v1937_v27 }
 0x206   : > { %2068 = vst.msk [vmem:[%s3273_s29 + $0x1f8] sm:$0xff] %vm2004_vm1, %v2003_v39 }
 0x207 PF: > { %s18_s26 = sadd.s32 1, %s2758_s26  }
 0x208   : > { %p15_p4 = scmp.ge.s32.totalorder %s18_s26, 4  }
 0x20a   :  { %17 = sbr.rel (!%p15_p4) target bundleno = 2 (0x2), region = 81 }

</bundles_post_ra>
